<compile_context>
chip_gen: v6e
topology: v6e:2x2x1
jax: 0.10.0
libtpu: 0.0.40
codegen_flags: <defaults>
</compile_context>

<pallas_src>
import jax
import jax.numpy as jnp
from jax.experimental import pallas as pl
from jax.experimental.pallas import tpu as pltpu

CPAD = 128   # every channel-like dim padded to one 128-lane vreg width
LPAD = 128   # codebook rows padded to 128 (padded rows get +1e30 distance)


# ----------------------------------------------------------------------------
# Fused kernel: encoder -> VQ -> decoder -> losses for one (model, batch-block)
# grid step.  Rows of all batch elements in the block are flattened together.
# ----------------------------------------------------------------------------
def _sep_vqvae_kernel(x_ref, nf_ref, nl_ref,
                      e1w, e1b, er3w, er3b, er1w, er1b, e2w, e2b,
                      cbT, cb, esq,
                      d1w, d1b, dr3w, dr3b, dr1w, dr1b,
                      dcew, dcow, dcb, dow, dob,
                      y_ref, stats_ref):
    f32, bf16 = jnp.float32, jnp.bfloat16
    R = x_ref.shape[0]                      # Bblk * n rows (static)

    not_first = nf_ref[...]                 # (R,1): 0.0 where t == 0
    not_last = nl_ref[...]                  # (R,1): 0.0 where t == n-1

    def shift_prev(h):                      # out[r] = h[r-1], 0 at element start
        return pltpu.roll(h, 1, axis=0) * not_first

    def shift_next(h):                      # out[r] = h[r+1], 0 at element end
        return pltpu.roll(h, R - 1, axis=0) * not_last

    def mm(a, w_ref):                       # bf16 MXU matmul, f32 accumulate
        return jnp.dot(a.astype(bf16), w_ref[...], preferred_element_type=f32)

    def conv3(h, w_ref, b_ref, act=False):  # 'same' K=3 conv: one depth-384 dot
        op = jnp.concatenate([shift_prev(h), h, shift_next(h)], axis=-1)
        acc = b_ref[...] + mm(op, w_ref)
        return jnp.maximum(acc, 0.0) if act else acc

    def conv1(h, w_ref, b_ref):
        return b_ref[...] + mm(h, w_ref)

    def resblock(h, w3, b3, w1, b1):
        r = jnp.maximum(h, 0.0)
        r = conv3(r, w3, b3, act=True)
        return conv1(r, w1, b1) + h

    x = x_ref[...]                          # (R, 4*CPAD) f32, all four taps

    # ---------------- encoder -----------------------------------------------
    # stride-2 K=4 conv fused into one depth-512 contraction
    h = e1b[...] + mm(x, e1w)
    h = resblock(h, er3w, er3b, er1w, er1b)
    xe = conv3(h, e2w, e2b)                 # (R, CPAD) f32

    # ---------------- VQ bottleneck ------------------------------------------
    x2 = jnp.sum(xe * xe, axis=-1, keepdims=True)
    dots = mm(xe, cbT)                      # bf16 distance matmul -> (R, LPAD)
    dist = x2 - 2.0 * dots + esq[...]       # padded codes carry +1e30
    min_d = jnp.min(dist, axis=-1, keepdims=True)
    lane = jax.lax.broadcasted_iota(jnp.int32, dist.shape, 1)
    idx = jnp.min(jnp.where(dist <= min_d, lane, LPAD), axis=-1, keepdims=True)
    onehot = (lane == idx).astype(f32)
    xq = jnp.dot(onehot, cb[...], preferred_element_type=f32)   # exact codes
    dq = xq - xe
    commit_sse = jnp.sum(jnp.sum(dq * dq, axis=1, keepdims=True),
                         axis=0, keepdims=True)                 # (1,1)

    # ---------------- decoder ------------------------------------------------
    h = conv3(xq, d1w, d1b)
    h = resblock(h, dr3w, dr3b, dr1w, dr1b)

    # polyphase ConvTranspose1d(stride=2, K=4, P=1): two depth-256 contractions
    #   u[2t]   = h[t-1]@W3 + h[t]@W1 + b
    #   u[2t+1] = h[t]@W2   + h[t+1]@W0 + b
    h_prev, h_next = shift_prev(h), shift_next(h)
    u_even = dcb[...] + mm(jnp.concatenate([h_prev, h], axis=-1), dcew)
    u_odd = dcb[...] + mm(jnp.concatenate([h, h_next], axis=-1), dcow)

    # final K=3 'same' conv in parity form (same fused weight for both phases)
    #   out[2t]   = u[2t-1]@V0 + u[2t]@V1 + u[2t+1]@V2 + b
    #   out[2t+1] = u[2t]@V0   + u[2t+1]@V1 + u[2t+2]@V2 + b
    uo_prev = shift_prev(u_odd)
    ue_next = shift_next(u_even)
    out_even = dob[...] + mm(
        jnp.concatenate([uo_prev, u_even, u_odd], axis=-1), dow)
    out_odd = dob[...] + mm(
        jnp.concatenate([u_even, u_odd, ue_next], axis=-1), dow)

    # ---------------- lane-dense output + fused losses ----------------------
    y_ref[...] = jnp.concatenate([out_even, out_odd], axis=-1)

    de = out_even - x[:, CPAD:2 * CPAD]      # original x[2t]
    do = out_odd - x[:, 2 * CPAD:3 * CPAD]   # original x[2t+1]
    recon_sse = (jnp.sum(jnp.sum(de * de, axis=1, keepdims=True),
                         axis=0, keepdims=True)
                 + jnp.sum(jnp.sum(do * do, axis=1, keepdims=True),
                           axis=0, keepdims=True))               # (1,1)

    lane1 = jax.lax.broadcasted_iota(jnp.int32, (1, CPAD), 1)
    stats_ref[...] = (jnp.where(lane1 == 0, commit_sse, 0.0)
                      + jnp.where(lane1 == 1, recon_sse, 0.0))


# ----------------------------------------------------------------------------
# Host-side packing: fused conv taps, padded to 128 lanes, bf16 weights
# ----------------------------------------------------------------------------
_PARAM_ORDER = ("e1w", "e1b", "er3w", "er3b", "er1w", "er1b", "e2w", "e2b",
                "cbT", "cb", "esq", "d1w", "d1b", "dr3w", "dr3b", "dr1w",
                "dr1b", "dcew", "dcow", "dcb", "dow", "dob")


def _pack_vqvae_params(p):
    f32, bf16 = jnp.float32, jnp.bfloat16
    cb = p["codebook"].astype(f32)
    l_bins, emb = cb.shape
    assert l_bins <= LPAD and emb <= CPAD

    def pad2(a, rows=CPAD, cols=CPAD):
        out = jnp.zeros((rows, cols), f32)
        return out.at[:a.shape[0], :a.shape[1]].set(a)

    def bias(b):
        return jnp.zeros((1, CPAD), f32).at[0, :b.shape[0]].set(b)

    def conv_taps(w):          # torch Conv1d (Cout, Cin, K) -> (K*CPAD, CPAD)
        k = w.shape[2]
        return jnp.concatenate([pad2(w[:, :, i].T) for i in range(k)],
                               axis=0).astype(bf16)

    def deconv_taps(w, taps):  # torch ConvTranspose1d (Cin, Cout, K)
        return jnp.concatenate([pad2(w[:, :, i]) for i in taps],
                               axis=0).astype(bf16)

    cb_pad = pad2(cb, LPAD, CPAD)
    return {
        "e1w": conv_taps(p["enc_conv1_w"]), "e1b": bias(p["enc_conv1_b"]),
        "er3w": conv_taps(p["enc_res3_w"]), "er3b": bias(p["enc_res3_b"]),
        "er1w": conv_taps(p["enc_res1_w"]), "er1b": bias(p["enc_res1_b"]),
        "e2w": conv_taps(p["enc_conv2_w"]), "e2b": bias(p["enc_conv2_b"]),
        "cbT": cb_pad.T.astype(bf16),
        "cb": cb_pad,
        "esq": jnp.full((1, LPAD), 1e30, f32).at[0, :l_bins].set(
            jnp.sum(cb * cb, axis=1)),
        "d1w": conv_taps(p["dec_conv1_w"]), "d1b": bias(p["dec_conv1_b"]),
        "dr3w": conv_taps(p["dec_res3_w"]), "dr3b": bias(p["dec_res3_b"]),
        "dr1w": conv_taps(p["dec_res1_w"]), "dr1b": bias(p["dec_res1_b"]),
        "dcew": deconv_taps(p["dec_deconv_w"], (3, 1)),
        "dcow": deconv_taps(p["dec_deconv_w"], (2, 0)),
        "dcb": bias(p["dec_deconv_b"]),
        "dow": conv_taps(p["dec_out_w"]), "dob": bias(p["dec_out_b"]),
    }


def _pack_input(x):
    # row (b, t) = [x_pad[2t] | x_pad[2t+1] | x_pad[2t+2] | x_pad[2t+3]]
    # (x_pad = x zero-padded by 1 frame each side, channels padded to 128 lanes)
    B, T, C = x.shape
    assert C <= CPAD and T % 2 == 0
    n = T // 2
    xp = jnp.pad(x.astype(jnp.float32), ((0, 0), (1, 1), (0, CPAD - C)))
    pairs = xp.reshape(B, n + 1, 2 * CPAD)
    xin = jnp.concatenate([pairs[:, :n, :], pairs[:, 1:, :]], axis=-1)
    return xin.reshape(B * n, 4 * CPAD)


def _pick_bblk(B, n, max_rows=1024):
    # whole batch per step if it fits; otherwise largest divisor of B whose row
    # count is a multiple of 8 (sublane tiling) and <= max_rows
    if B * n <= max_rows:
        return B
    for bb in range(B, 0, -1):
        if B % bb == 0 and bb * n <= max_rows and (bb * n) % 8 == 0:
            return bb
    return B


# ----------------------------------------------------------------------------
# Single fused pallas_call for both VQVAEs (body = model 0, hands = model 1)
# ----------------------------------------------------------------------------
def _fused_sep_call(stacked, x_stack, n, bblk):
    nm, BN, _ = x_stack.shape               # nm == 2 models, BN == B * n rows
    R = bblk * n
    nb = BN // R

    t_idx = jnp.tile(jnp.arange(n, dtype=jnp.int32), bblk)
    nf = (t_idx != 0).astype(jnp.float32).reshape(R, 1)
    nl = (t_idx != n - 1).astype(jnp.float32).reshape(R, 1)

    weights = [stacked[k] for k in _PARAM_ORDER]

    def wspec(a):   # resident weights: constant index along batch axis
        return pl.BlockSpec((None,) + a.shape[1:], lambda m, b: (m, 0, 0))

    in_specs = ([pl.BlockSpec((None, R, 4 * CPAD), lambda m, b: (m, b, 0)),
                 pl.BlockSpec((R, 1), lambda m, b: (0, 0)),
                 pl.BlockSpec((R, 1), lambda m, b: (0, 0))]
                + [wspec(a) for a in weights])
    out_specs = (pl.BlockSpec((None, R, 2 * CPAD), lambda m, b: (m, b, 0)),
                 pl.BlockSpec((None, None, 1, CPAD), lambda m, b: (m, b, 0, 0)))
    out_shape = (jax.ShapeDtypeStruct((nm, BN, 2 * CPAD), jnp.float32),
                 jax.ShapeDtypeStruct((nm, nb, 1, CPAD), jnp.float32))

    depth_sum = 3840                         # total contraction depth per row
    flops = int(2 * nm * BN * CPAD * depth_sum)
    bytes_accessed = int(x_stack.size * 4 + 2 * R * 4
                         + sum(int(w.size) * w.dtype.itemsize for w in weights)
                         + nm * BN * 2 * CPAD * 4 + nm * nb * CPAD * 4)

    return pl.pallas_call(
        _sep_vqvae_kernel,
        out_shape=out_shape,
        grid=(nm, nb),
        in_specs=in_specs,
        out_specs=out_specs,
        compiler_params=pltpu.CompilerParams(
            dimension_semantics=("parallel", "parallel")),
        cost_estimate=pl.CostEstimate(flops=flops, transcendentals=0,
                                      bytes_accessed=bytes_accessed),
    )(x_stack, nf, nl, *weights)


# ----------------------------------------------------------------------------
# SepVQVAE_DDP_body_hands.forward
# ----------------------------------------------------------------------------
def sep_vqvae_forward(params_body, params_hands, cfg, x_all_body,
                      commit_beta=0.02):
    b, t, c = x_all_body.shape
    assert t % 2 == 0
    n = t // 2
    cn = cfg["joint_channel"]
    x4 = x_all_body.reshape(b, t, c // cn, cn)
    j = x4.shape[2]

    body_idx = jnp.array(cfg["body_idx"], jnp.int32)
    hands_idx = jnp.array(cfg["hands_idx"], jnp.int32)
    hands_sel = jnp.array(cfg["hands_dim_sel"], jnp.int32)

    x_body = x4[:, :, body_idx, :].reshape(b, t, -1)
    x_hands_mid = x4[:, :, hands_idx, :].reshape(b, t, -1)
    x_hands = x_hands_mid[:, :, hands_sel]
    c_body, c_hands = x_body.shape[-1], x_hands.shape[-1]

    x_stack = jnp.stack([_pack_input(x_body), _pack_input(x_hands)], axis=0)

    pb = _pack_vqvae_params(params_body)
    ph = _pack_vqvae_params(params_hands)
    stacked = {k: jnp.stack([pb[k], ph[k]], axis=0) for k in _PARAM_ORDER}

    bblk = _pick_bblk(b, n)
    y, stats = _fused_sep_call(stacked, x_stack, n, bblk)

    def unpack(m, cdim):
        return y[m].reshape(b, n, 2, CPAD)[:, :, :, :cdim].reshape(b, t, cdim)

    x_out_body = unpack(0, c_body)
    x_out_hands = unpack(1, c_hands)

    def losses(m, emb, cdim):
        commit = jnp.sum(stats[m, :, 0, 0]) / float(b * n * emb)
        recon = jnp.sum(stats[m, :, 0, 1]) / float(b * t * cdim)
        loss = recon + commit_beta * commit
        return loss, {"recons_loss": recon, "commit_loss": commit}

    loss_body, metrics_body = losses(0, params_body["codebook"].shape[1], c_body)
    loss_hands, metrics_hands = losses(1, params_hands["codebook"].shape[1],
                                       c_hands)

    x_out_hands_mid = jnp.zeros((b, t, len(cfg["hands_idx"]) * cn), jnp.float32)
    x_out_hands_mid = x_out_hands_mid.at[:, :, hands_sel].set(x_out_hands)

    out = jnp.zeros((b, t, j, cn), jnp.float32)
    out = out.at[:, :, body_idx, :].set(
        x_out_body.reshape(b, t, len(cfg["body_idx"]), cn))
    out = out.at[:, :, hands_idx, :].set(
        x_out_hands_mid.reshape(b, t, len(cfg["hands_idx"]), cn))

    total_loss = cfg["body_weight"] * loss_body + cfg["hands_weight"] * loss_hands
    return (out.reshape(b, t, -1), total_loss, loss_body, loss_hands,
            [metrics_body, metrics_hands])


# ----------------------------------------------------------------------------
# Synthetic single-level VQVAE parameters (torch-layout weights)
# ----------------------------------------------------------------------------
def init_vqvae_params(key, in_dim, width, emb_width, l_bins):
    ks = jax.random.split(key, 12)
    rnd = lambda k, s: jax.random.normal(k, s, jnp.float32) * 0.1
    zro = lambda s: jnp.zeros(s, jnp.float32)
    return {
        # encoder
        "enc_conv1_w": rnd(ks[0], (width, in_dim, 4)), "enc_conv1_b": zro((width,)),
        "enc_res3_w": rnd(ks[1], (width, width, 3)), "enc_res3_b": zro((width,)),
        "enc_res1_w": rnd(ks[2], (width, width, 1)), "enc_res1_b": zro((width,)),
        "enc_conv2_w": rnd(ks[3], (emb_width, width, 3)), "enc_conv2_b": zro((emb_width,)),
        # bottleneck
        "codebook": rnd(ks[4], (l_bins, emb_width)),
        # decoder
        "dec_conv1_w": rnd(ks[5], (width, emb_width, 3)), "dec_conv1_b": zro((width,)),
        "dec_res3_w": rnd(ks[6], (width, width, 3)), "dec_res3_b": zro((width,)),
        "dec_res1_w": rnd(ks[7], (width, width, 1)), "dec_res1_b": zro((width,)),
        "dec_deconv_w": rnd(ks[8], (width, width, 4)), "dec_deconv_b": zro((width,)),
        "dec_out_w": rnd(ks[9], (in_dim, width, 3)), "dec_out_b": zro((in_dim,)),
    }


# ----------------------------------------------------------------------------
if __name__ == "__main__":
    cfg = {
        "joint_channel": 3,
        "body_idx": list(range(0, 10)),      # 10 body joints  -> 30 dims
        "hands_idx": list(range(10, 16)),    # 6 hand joints   -> 18 dims
        "body_weight": 1.0,
        "hands_weight": 1.0,
    }
    cfg["hands_dim_sel"] = list(range(0, 3 * len(cfg["hands_idx"])))

    WIDTH, EMB, LBINS = 32, 16, 32

    pk = jax.random.PRNGKey(0)
    k_x, k_body, k_hands = jax.random.split(pk, 3)

    params_body = init_vqvae_params(k_body, 3 * len(cfg["body_idx"]),
                                    WIDTH, EMB, LBINS)
    params_hands = init_vqvae_params(k_hands, 3 * len(cfg["hands_idx"]),
                                     WIDTH, EMB, LBINS)

    B, T = 2, 16
    C = (len(cfg["body_idx"]) + len(cfg["hands_idx"])) * cfg["joint_channel"]  # 48
    x_all_body = jax.random.normal(k_x, (B, T, C), jnp.float32)

    @jax.jit
    def run(x):
        return sep_vqvae_forward(params_body, params_hands, cfg, x)

    x_out, total_loss, loss_body, loss_hands, metrics = run(x_all_body)
    jax.block_until_ready((x_out, total_loss, loss_body, loss_hands, metrics))
    assert x_out.shape == (B, T, C)
    print("KERNEL_OK")
</pallas_src>

<mosaic_0001>
module attributes {stable_mosaic.version = 11 : i64} {
  func.func @_sep_vqvae_kernel(%arg0: i32, %arg1: i32, %arg2: memref<1x16x512xf32, #tpu.memory_space<vmem>>, %arg3: memref<16x1xf32, #tpu.memory_space<vmem>>, %arg4: memref<16x1xf32, #tpu.memory_space<vmem>>, %arg5: memref<1x512x128xbf16, #tpu.memory_space<vmem>>, %arg6: memref<1x1x128xf32, #tpu.memory_space<vmem>>, %arg7: memref<1x384x128xbf16, #tpu.memory_space<vmem>>, %arg8: memref<1x1x128xf32, #tpu.memory_space<vmem>>, %arg9: memref<1x128x128xbf16, #tpu.memory_space<vmem>>, %arg10: memref<1x1x128xf32, #tpu.memory_space<vmem>>, %arg11: memref<1x384x128xbf16, #tpu.memory_space<vmem>>, %arg12: memref<1x1x128xf32, #tpu.memory_space<vmem>>, %arg13: memref<1x128x128xbf16, #tpu.memory_space<vmem>>, %arg14: memref<1x128x128xf32, #tpu.memory_space<vmem>>, %arg15: memref<1x1x128xf32, #tpu.memory_space<vmem>>, %arg16: memref<1x384x128xbf16, #tpu.memory_space<vmem>>, %arg17: memref<1x1x128xf32, #tpu.memory_space<vmem>>, %arg18: memref<1x384x128xbf16, #tpu.memory_space<vmem>>, %arg19: memref<1x1x128xf32, #tpu.memory_space<vmem>>, %arg20: memref<1x128x128xbf16, #tpu.memory_space<vmem>>, %arg21: memref<1x1x128xf32, #tpu.memory_space<vmem>>, %arg22: memref<1x256x128xbf16, #tpu.memory_space<vmem>>, %arg23: memref<1x256x128xbf16, #tpu.memory_space<vmem>>, %arg24: memref<1x1x128xf32, #tpu.memory_space<vmem>>, %arg25: memref<1x384x128xbf16, #tpu.memory_space<vmem>>, %arg26: memref<1x1x128xf32, #tpu.memory_space<vmem>>, %arg27: memref<1x16x256xf32, #tpu.memory_space<vmem>>, %arg28: memref<1x1x1x128xf32, #tpu.memory_space<vmem>>) attributes {dimension_semantics = [#tpu.dimension_semantics<parallel>, #tpu.dimension_semantics<parallel>], iteration_bounds = array<i64: 2, 1>, scalar_prefetch = 0 : i64, scratch_operands = 0 : i64, tpu.core_type = #tpu.core_type<tc>, window_params = [{transform_indices = @transform_0, window_bounds = array<i64: 1, 16, 512>}, {pipeline_mode = #tpu.pipeline_mode<synchronous>, transform_indices = @transform_1, window_bounds = array<i64: 16, 1>}, {pipeline_mode = #tpu.pipeline_mode<synchronous>, transform_indices = @transform_2, window_bounds = array<i64: 16, 1>}, {transform_indices = @transform_3, window_bounds = array<i64: 1, 512, 128>}, {transform_indices = @transform_4, window_bounds = array<i64: 1, 1, 128>}, {transform_indices = @transform_5, window_bounds = array<i64: 1, 384, 128>}, {transform_indices = @transform_6, window_bounds = array<i64: 1, 1, 128>}, {transform_indices = @transform_7, window_bounds = array<i64: 1, 128, 128>}, {transform_indices = @transform_8, window_bounds = array<i64: 1, 1, 128>}, {transform_indices = @transform_9, window_bounds = array<i64: 1, 384, 128>}, {transform_indices = @transform_10, window_bounds = array<i64: 1, 1, 128>}, {transform_indices = @transform_11, window_bounds = array<i64: 1, 128, 128>}, {transform_indices = @transform_12, window_bounds = array<i64: 1, 128, 128>}, {transform_indices = @transform_13, window_bounds = array<i64: 1, 1, 128>}, {transform_indices = @transform_14, window_bounds = array<i64: 1, 384, 128>}, {transform_indices = @transform_15, window_bounds = array<i64: 1, 1, 128>}, {transform_indices = @transform_16, window_bounds = array<i64: 1, 384, 128>}, {transform_indices = @transform_17, window_bounds = array<i64: 1, 1, 128>}, {transform_indices = @transform_18, window_bounds = array<i64: 1, 128, 128>}, {transform_indices = @transform_19, window_bounds = array<i64: 1, 1, 128>}, {transform_indices = @transform_20, window_bounds = array<i64: 1, 256, 128>}, {transform_indices = @transform_21, window_bounds = array<i64: 1, 256, 128>}, {transform_indices = @transform_22, window_bounds = array<i64: 1, 1, 128>}, {transform_indices = @transform_23, window_bounds = array<i64: 1, 384, 128>}, {transform_indices = @transform_24, window_bounds = array<i64: 1, 1, 128>}, {transform_indices = @transform_25, window_bounds = array<i64: 1, 16, 256>}, {transform_indices = @transform_26, window_bounds = array<i64: 1, 1, 1, 128>}]} {
    %c0 = arith.constant 0 : index
    %c0_0 = arith.constant 0 : index
    %0 = vector.load %arg3[%c0, %c0_0] : memref<16x1xf32, #tpu.memory_space<vmem>>, vector<16x1xf32>
    %c0_1 = arith.constant 0 : index
    %c0_2 = arith.constant 0 : index
    %1 = vector.load %arg4[%c0_1, %c0_2] : memref<16x1xf32, #tpu.memory_space<vmem>>, vector<16x1xf32>
    %c0_3 = arith.constant 0 : index
    %c0_4 = arith.constant 0 : index
    %c0_5 = arith.constant 0 : index
    %2 = vector.load %arg2[%c0_3, %c0_4, %c0_5] : memref<1x16x512xf32, #tpu.memory_space<vmem>>, vector<1x16x512xf32>
    %3 = vector.shape_cast %2 : vector<1x16x512xf32> to vector<16x512xf32>
    %c0_6 = arith.constant 0 : index
    %c0_7 = arith.constant 0 : index
    %c0_8 = arith.constant 0 : index
    %4 = vector.load %arg6[%c0_6, %c0_7, %c0_8] : memref<1x1x128xf32, #tpu.memory_space<vmem>>, vector<1x1x128xf32>
    %5 = vector.shape_cast %4 : vector<1x1x128xf32> to vector<1x128xf32>
    %6 = arith.truncf %3 : vector<16x512xf32> to vector<16x512xbf16>
    %c0_9 = arith.constant 0 : index
    %c0_10 = arith.constant 0 : index
    %c0_11 = arith.constant 0 : index
    %7 = vector.load %arg5[%c0_9, %c0_10, %c0_11] : memref<1x512x128xbf16, #tpu.memory_space<vmem>>, vector<1x512x128xbf16>
    %8 = vector.shape_cast %7 : vector<1x512x128xbf16> to vector<512x128xbf16>
    %cst = arith.constant dense<0.000000e+00> : vector<16x128xf32>
    %9 = tpu.matmul %6, %8, %cst {dimension_numbers = #tpu.dot_dimension_numbers<[1], [0], [0], [1], [0, 0, 1, 1], [], []>} : vector<16x512xbf16>, vector<512x128xbf16>, vector<16x128xf32> -> vector<16x128xf32>
    %10 = vector.broadcast %5 : vector<1x128xf32> to vector<16x128xf32>
    %11 = arith.addf %10, %9 : vector<16x128xf32>
    %cst_12 = arith.constant 0.000000e+00 : f32
    %12 = vector.broadcast %cst_12 : f32 to vector<16x128xf32>
    %13 = arith.maximumf %11, %12 : vector<16x128xf32>
    %c1_i32 = arith.constant 1 : i32
    %14 = tpu.dynamic_rotate %13 by %c1_i32 dim 0 : vector<16x128xf32>, i32 -> vector<16x128xf32>
    %15 = vector.broadcast %0 : vector<16x1xf32> to vector<16x128xf32>
    %16 = arith.mulf %14, %15 : vector<16x128xf32>
    %c15_i32 = arith.constant 15 : i32
    %17 = tpu.dynamic_rotate %13 by %c15_i32 dim 0 : vector<16x128xf32>, i32 -> vector<16x128xf32>
    %18 = vector.broadcast %1 : vector<16x1xf32> to vector<16x128xf32>
    %19 = arith.mulf %17, %18 : vector<16x128xf32>
    %20 = tpu.concatenate %16, %13, %19 in 1 : vector<16x128xf32>, vector<16x128xf32>, vector<16x128xf32> -> vector<16x384xf32>
    %c0_13 = arith.constant 0 : index
    %c0_14 = arith.constant 0 : index
    %c0_15 = arith.constant 0 : index
    %21 = vector.load %arg8[%c0_13, %c0_14, %c0_15] : memref<1x1x128xf32, #tpu.memory_space<vmem>>, vector<1x1x128xf32>
    %22 = vector.shape_cast %21 : vector<1x1x128xf32> to vector<1x128xf32>
    %23 = arith.truncf %20 : vector<16x384xf32> to vector<16x384xbf16>
    %c0_16 = arith.constant 0 : index
    %c0_17 = arith.constant 0 : index
    %c0_18 = arith.constant 0 : index
    %24 = vector.load %arg7[%c0_16, %c0_17, %c0_18] : memref<1x384x128xbf16, #tpu.memory_space<vmem>>, vector<1x384x128xbf16>
    %25 = vector.shape_cast %24 : vector<1x384x128xbf16> to vector<384x128xbf16>
    %cst_19 = arith.constant dense<0.000000e+00> : vector<16x128xf32>
    %26 = tpu.matmul %23, %25, %cst_19 {dimension_numbers = #tpu.dot_dimension_numbers<[1], [0], [0], [1], [0, 0, 1, 1], [], []>} : vector<16x384xbf16>, vector<384x128xbf16>, vector<16x128xf32> -> vector<16x128xf32>
    %27 = vector.broadcast %22 : vector<1x128xf32> to vector<16x128xf32>
    %28 = arith.addf %27, %26 : vector<16x128xf32>
    %cst_20 = arith.constant 0.000000e+00 : f32
    %29 = vector.broadcast %cst_20 : f32 to vector<16x128xf32>
    %30 = arith.maximumf %28, %29 : vector<16x128xf32>
    %c0_21 = arith.constant 0 : index
    %c0_22 = arith.constant 0 : index
    %c0_23 = arith.constant 0 : index
    %31 = vector.load %arg10[%c0_21, %c0_22, %c0_23] : memref<1x1x128xf32, #tpu.memory_space<vmem>>, vector<1x1x128xf32>
    %32 = vector.shape_cast %31 : vector<1x1x128xf32> to vector<1x128xf32>
    %33 = arith.truncf %30 : vector<16x128xf32> to vector<16x128xbf16>
    %c0_24 = arith.constant 0 : index
    %c0_25 = arith.constant 0 : index
    %c0_26 = arith.constant 0 : index
    %34 = vector.load %arg9[%c0_24, %c0_25, %c0_26] : memref<1x128x128xbf16, #tpu.memory_space<vmem>>, vector<1x128x128xbf16>
    %35 = vector.shape_cast %34 : vector<1x128x128xbf16> to vector<128x128xbf16>
    %cst_27 = arith.constant dense<0.000000e+00> : vector<16x128xf32>
    %36 = tpu.matmul %33, %35, %cst_27 {dimension_numbers = #tpu.dot_dimension_numbers<[1], [0], [0], [1], [0, 0, 1, 1], [], []>} : vector<16x128xbf16>, vector<128x128xbf16>, vector<16x128xf32> -> vector<16x128xf32>
    %37 = vector.broadcast %32 : vector<1x128xf32> to vector<16x128xf32>
    %38 = arith.addf %37, %36 : vector<16x128xf32>
    %39 = arith.addf %38, %11 : vector<16x128xf32>
    %c1_i32_28 = arith.constant 1 : i32
    %40 = tpu.dynamic_rotate %39 by %c1_i32_28 dim 0 : vector<16x128xf32>, i32 -> vector<16x128xf32>
    %41 = vector.broadcast %0 : vector<16x1xf32> to vector<16x128xf32>
    %42 = arith.mulf %40, %41 : vector<16x128xf32>
    %c15_i32_29 = arith.constant 15 : i32
    %43 = tpu.dynamic_rotate %39 by %c15_i32_29 dim 0 : vector<16x128xf32>, i32 -> vector<16x128xf32>
    %44 = vector.broadcast %1 : vector<16x1xf32> to vector<16x128xf32>
    %45 = arith.mulf %43, %44 : vector<16x128xf32>
    %46 = tpu.concatenate %42, %39, %45 in 1 : vector<16x128xf32>, vector<16x128xf32>, vector<16x128xf32> -> vector<16x384xf32>
    %c0_30 = arith.constant 0 : index
    %c0_31 = arith.constant 0 : index
    %c0_32 = arith.constant 0 : index
    %47 = vector.load %arg12[%c0_30, %c0_31, %c0_32] : memref<1x1x128xf32, #tpu.memory_space<vmem>>, vector<1x1x128xf32>
    %48 = vector.shape_cast %47 : vector<1x1x128xf32> to vector<1x128xf32>
    %49 = arith.truncf %46 : vector<16x384xf32> to vector<16x384xbf16>
    %c0_33 = arith.constant 0 : index
    %c0_34 = arith.constant 0 : index
    %c0_35 = arith.constant 0 : index
    %50 = vector.load %arg11[%c0_33, %c0_34, %c0_35] : memref<1x384x128xbf16, #tpu.memory_space<vmem>>, vector<1x384x128xbf16>
    %51 = vector.shape_cast %50 : vector<1x384x128xbf16> to vector<384x128xbf16>
    %cst_36 = arith.constant dense<0.000000e+00> : vector<16x128xf32>
    %52 = tpu.matmul %49, %51, %cst_36 {dimension_numbers = #tpu.dot_dimension_numbers<[1], [0], [0], [1], [0, 0, 1, 1], [], []>} : vector<16x384xbf16>, vector<384x128xbf16>, vector<16x128xf32> -> vector<16x128xf32>
    %53 = vector.broadcast %48 : vector<1x128xf32> to vector<16x128xf32>
    %54 = arith.addf %53, %52 : vector<16x128xf32>
    %55 = arith.mulf %54, %54 : vector<16x128xf32>
    %cst_37 = arith.constant dense<0.000000e+00> : vector<16xf32>
    %56 = vector.multi_reduction <add>, %55, %cst_37 [1] : vector<16x128xf32> to vector<16xf32>
    %57 = vector.shape_cast %56 : vector<16xf32> to vector<16x1xf32>
    %58 = arith.truncf %54 : vector<16x128xf32> to vector<16x128xbf16>
    %c0_38 = arith.constant 0 : index
    %c0_39 = arith.constant 0 : index
    %c0_40 = arith.constant 0 : index
    %59 = vector.load %arg13[%c0_38, %c0_39, %c0_40] : memref<1x128x128xbf16, #tpu.memory_space<vmem>>, vector<1x128x128xbf16>
    %60 = vector.shape_cast %59 : vector<1x128x128xbf16> to vector<128x128xbf16>
    %cst_41 = arith.constant dense<0.000000e+00> : vector<16x128xf32>
    %61 = tpu.matmul %58, %60, %cst_41 {dimension_numbers = #tpu.dot_dimension_numbers<[1], [0], [0], [1], [0, 0, 1, 1], [], []>} : vector<16x128xbf16>, vector<128x128xbf16>, vector<16x128xf32> -> vector<16x128xf32>
    %cst_42 = arith.constant 2.000000e+00 : f32
    %62 = vector.broadcast %cst_42 : f32 to vector<16x128xf32>
    %63 = arith.mulf %62, %61 : vector<16x128xf32>
    %64 = vector.broadcast %57 : vector<16x1xf32> to vector<16x128xf32>
    %65 = arith.subf %64, %63 : vector<16x128xf32>
    %c0_43 = arith.constant 0 : index
    %c0_44 = arith.constant 0 : index
    %c0_45 = arith.constant 0 : index
    %66 = vector.load %arg15[%c0_43, %c0_44, %c0_45] : memref<1x1x128xf32, #tpu.memory_space<vmem>>, vector<1x1x128xf32>
    %67 = vector.shape_cast %66 : vector<1x1x128xf32> to vector<1x128xf32>
    %68 = vector.broadcast %67 : vector<1x128xf32> to vector<16x128xf32>
    %69 = arith.addf %65, %68 : vector<16x128xf32>
    %cst_46 = arith.constant dense<0x7F800000> : vector<16xf32>
    %70 = vector.multi_reduction <minimumf>, %69, %cst_46 [1] : vector<16x128xf32> to vector<16xf32>
    %71 = vector.shape_cast %70 : vector<16xf32> to vector<16x1xf32>
    %72 = tpu.iota {dimensions = array<i32: 1>} : vector<16x128xi32>
    %73 = vector.broadcast %71 : vector<16x1xf32> to vector<16x128xf32>
    %74 = arith.cmpf ole, %69, %73 : vector<16x128xf32>
    %c128_i32 = arith.constant 128 : i32
    %75 = vector.broadcast %c128_i32 : i32 to vector<16x128xi32>
    %76 = arith.select %74, %72, %75 : vector<16x128xi1>, vector<16x128xi32>
    %cst_47 = arith.constant dense<2147483647> : vector<16xi32>
    %77 = vector.multi_reduction <minsi>, %76, %cst_47 [1] : vector<16x128xi32> to vector<16xi32>
    %78 = vector.shape_cast %77 : vector<16xi32> to vector<16x1xi32>
    %79 = vector.broadcast %78 : vector<16x1xi32> to vector<16x128xi32>
    %80 = arith.cmpi eq, %72, %79 : vector<16x128xi32>
    %81 = arith.extui %80 : vector<16x128xi1> to vector<16x128xi32>
    %82 = arith.sitofp %81 : vector<16x128xi32> to vector<16x128xf32>
    %c0_48 = arith.constant 0 : index
    %c0_49 = arith.constant 0 : index
    %c0_50 = arith.constant 0 : index
    %83 = vector.load %arg14[%c0_48, %c0_49, %c0_50] : memref<1x128x128xf32, #tpu.memory_space<vmem>>, vector<1x128x128xf32>
    %84 = vector.shape_cast %83 : vector<1x128x128xf32> to vector<128x128xf32>
    %cst_51 = arith.constant dense<0.000000e+00> : vector<16x128xf32>
    %85 = tpu.matmul %82, %84, %cst_51 {dimension_numbers = #tpu.dot_dimension_numbers<[1], [0], [0], [1], [0, 0, 1, 1], [], []>} : vector<16x128xf32>, vector<128x128xf32>, vector<16x128xf32> -> vector<16x128xf32>
    %86 = arith.subf %85, %54 : vector<16x128xf32>
    %87 = arith.mulf %86, %86 : vector<16x128xf32>
    %cst_52 = arith.constant dense<0.000000e+00> : vector<16xf32>
    %88 = vector.multi_reduction <add>, %87, %cst_52 [1] : vector<16x128xf32> to vector<16xf32>
    %89 = vector.shape_cast %88 : vector<16xf32> to vector<16x1xf32>
    %cst_53 = arith.constant dense<0.000000e+00> : vector<1xf32>
    %90 = vector.multi_reduction <add>, %89, %cst_53 [0] : vector<16x1xf32> to vector<1xf32>
    %91 = vector.shape_cast %90 : vector<1xf32> to vector<1x1xf32>
    %c1_i32_54 = arith.constant 1 : i32
    %92 = tpu.dynamic_rotate %85 by %c1_i32_54 dim 0 : vector<16x128xf32>, i32 -> vector<16x128xf32>
    %93 = vector.broadcast %0 : vector<16x1xf32> to vector<16x128xf32>
    %94 = arith.mulf %92, %93 : vector<16x128xf32>
    %c15_i32_55 = arith.constant 15 : i32
    %95 = tpu.dynamic_rotate %85 by %c15_i32_55 dim 0 : vector<16x128xf32>, i32 -> vector<16x128xf32>
    %96 = vector.broadcast %1 : vector<16x1xf32> to vector<16x128xf32>
    %97 = arith.mulf %95, %96 : vector<16x128xf32>
    %98 = tpu.concatenate %94, %85, %97 in 1 : vector<16x128xf32>, vector<16x128xf32>, vector<16x128xf32> -> vector<16x384xf32>
    %c0_56 = arith.constant 0 : index
    %c0_57 = arith.constant 0 : index
    %c0_58 = arith.constant 0 : index
    %99 = vector.load %arg17[%c0_56, %c0_57, %c0_58] : memref<1x1x128xf32, #tpu.memory_space<vmem>>, vector<1x1x128xf32>
    %100 = vector.shape_cast %99 : vector<1x1x128xf32> to vector<1x128xf32>
    %101 = arith.truncf %98 : vector<16x384xf32> to vector<16x384xbf16>
    %c0_59 = arith.constant 0 : index
    %c0_60 = arith.constant 0 : index
    %c0_61 = arith.constant 0 : index
    %102 = vector.load %arg16[%c0_59, %c0_60, %c0_61] : memref<1x384x128xbf16, #tpu.memory_space<vmem>>, vector<1x384x128xbf16>
    %103 = vector.shape_cast %102 : vector<1x384x128xbf16> to vector<384x128xbf16>
    %cst_62 = arith.constant dense<0.000000e+00> : vector<16x128xf32>
    %104 = tpu.matmul %101, %103, %cst_62 {dimension_numbers = #tpu.dot_dimension_numbers<[1], [0], [0], [1], [0, 0, 1, 1], [], []>} : vector<16x384xbf16>, vector<384x128xbf16>, vector<16x128xf32> -> vector<16x128xf32>
    %105 = vector.broadcast %100 : vector<1x128xf32> to vector<16x128xf32>
    %106 = arith.addf %105, %104 : vector<16x128xf32>
    %cst_63 = arith.constant 0.000000e+00 : f32
    %107 = vector.broadcast %cst_63 : f32 to vector<16x128xf32>
    %108 = arith.maximumf %106, %107 : vector<16x128xf32>
    %c1_i32_64 = arith.constant 1 : i32
    %109 = tpu.dynamic_rotate %108 by %c1_i32_64 dim 0 : vector<16x128xf32>, i32 -> vector<16x128xf32>
    %110 = vector.broadcast %0 : vector<16x1xf32> to vector<16x128xf32>
    %111 = arith.mulf %109, %110 : vector<16x128xf32>
    %c15_i32_65 = arith.constant 15 : i32
    %112 = tpu.dynamic_rotate %108 by %c15_i32_65 dim 0 : vector<16x128xf32>, i32 -> vector<16x128xf32>
    %113 = vector.broadcast %1 : vector<16x1xf32> to vector<16x128xf32>
    %114 = arith.mulf %112, %113 : vector<16x128xf32>
    %115 = tpu.concatenate %111, %108, %114 in 1 : vector<16x128xf32>, vector<16x128xf32>, vector<16x128xf32> -> vector<16x384xf32>
    %c0_66 = arith.constant 0 : index
    %c0_67 = arith.constant 0 : index
    %c0_68 = arith.constant 0 : index
    %116 = vector.load %arg19[%c0_66, %c0_67, %c0_68] : memref<1x1x128xf32, #tpu.memory_space<vmem>>, vector<1x1x128xf32>
    %117 = vector.shape_cast %116 : vector<1x1x128xf32> to vector<1x128xf32>
    %118 = arith.truncf %115 : vector<16x384xf32> to vector<16x384xbf16>
    %c0_69 = arith.constant 0 : index
    %c0_70 = arith.constant 0 : index
    %c0_71 = arith.constant 0 : index
    %119 = vector.load %arg18[%c0_69, %c0_70, %c0_71] : memref<1x384x128xbf16, #tpu.memory_space<vmem>>, vector<1x384x128xbf16>
    %120 = vector.shape_cast %119 : vector<1x384x128xbf16> to vector<384x128xbf16>
    %cst_72 = arith.constant dense<0.000000e+00> : vector<16x128xf32>
    %121 = tpu.matmul %118, %120, %cst_72 {dimension_numbers = #tpu.dot_dimension_numbers<[1], [0], [0], [1], [0, 0, 1, 1], [], []>} : vector<16x384xbf16>, vector<384x128xbf16>, vector<16x128xf32> -> vector<16x128xf32>
    %122 = vector.broadcast %117 : vector<1x128xf32> to vector<16x128xf32>
    %123 = arith.addf %122, %121 : vector<16x128xf32>
    %cst_73 = arith.constant 0.000000e+00 : f32
    %124 = vector.broadcast %cst_73 : f32 to vector<16x128xf32>
    %125 = arith.maximumf %123, %124 : vector<16x128xf32>
    %c0_74 = arith.constant 0 : index
    %c0_75 = arith.constant 0 : index
    %c0_76 = arith.constant 0 : index
    %126 = vector.load %arg21[%c0_74, %c0_75, %c0_76] : memref<1x1x128xf32, #tpu.memory_space<vmem>>, vector<1x1x128xf32>
    %127 = vector.shape_cast %126 : vector<1x1x128xf32> to vector<1x128xf32>
    %128 = arith.truncf %125 : vector<16x128xf32> to vector<16x128xbf16>
    %c0_77 = arith.constant 0 : index
    %c0_78 = arith.constant 0 : index
    %c0_79 = arith.constant 0 : index
    %129 = vector.load %arg20[%c0_77, %c0_78, %c0_79] : memref<1x128x128xbf16, #tpu.memory_space<vmem>>, vector<1x128x128xbf16>
    %130 = vector.shape_cast %129 : vector<1x128x128xbf16> to vector<128x128xbf16>
    %cst_80 = arith.constant dense<0.000000e+00> : vector<16x128xf32>
    %131 = tpu.matmul %128, %130, %cst_80 {dimension_numbers = #tpu.dot_dimension_numbers<[1], [0], [0], [1], [0, 0, 1, 1], [], []>} : vector<16x128xbf16>, vector<128x128xbf16>, vector<16x128xf32> -> vector<16x128xf32>
    %132 = vector.broadcast %127 : vector<1x128xf32> to vector<16x128xf32>
    %133 = arith.addf %132, %131 : vector<16x128xf32>
    %134 = arith.addf %133, %106 : vector<16x128xf32>
    %c1_i32_81 = arith.constant 1 : i32
    %135 = tpu.dynamic_rotate %134 by %c1_i32_81 dim 0 : vector<16x128xf32>, i32 -> vector<16x128xf32>
    %136 = vector.broadcast %0 : vector<16x1xf32> to vector<16x128xf32>
    %137 = arith.mulf %135, %136 : vector<16x128xf32>
    %c15_i32_82 = arith.constant 15 : i32
    %138 = tpu.dynamic_rotate %134 by %c15_i32_82 dim 0 : vector<16x128xf32>, i32 -> vector<16x128xf32>
    %139 = vector.broadcast %1 : vector<16x1xf32> to vector<16x128xf32>
    %140 = arith.mulf %138, %139 : vector<16x128xf32>
    %c0_83 = arith.constant 0 : index
    %c0_84 = arith.constant 0 : index
    %c0_85 = arith.constant 0 : index
    %141 = vector.load %arg24[%c0_83, %c0_84, %c0_85] : memref<1x1x128xf32, #tpu.memory_space<vmem>>, vector<1x1x128xf32>
    %142 = vector.shape_cast %141 : vector<1x1x128xf32> to vector<1x128xf32>
    %143 = tpu.concatenate %137, %134 in 1 : vector<16x128xf32>, vector<16x128xf32> -> vector<16x256xf32>
    %144 = arith.truncf %143 : vector<16x256xf32> to vector<16x256xbf16>
    %c0_86 = arith.constant 0 : index
    %c0_87 = arith.constant 0 : index
    %c0_88 = arith.constant 0 : index
    %145 = vector.load %arg22[%c0_86, %c0_87, %c0_88] : memref<1x256x128xbf16, #tpu.memory_space<vmem>>, vector<1x256x128xbf16>
    %146 = vector.shape_cast %145 : vector<1x256x128xbf16> to vector<256x128xbf16>
    %cst_89 = arith.constant dense<0.000000e+00> : vector<16x128xf32>
    %147 = tpu.matmul %144, %146, %cst_89 {dimension_numbers = #tpu.dot_dimension_numbers<[1], [0], [0], [1], [0, 0, 1, 1], [], []>} : vector<16x256xbf16>, vector<256x128xbf16>, vector<16x128xf32> -> vector<16x128xf32>
    %148 = vector.broadcast %142 : vector<1x128xf32> to vector<16x128xf32>
    %149 = arith.addf %148, %147 : vector<16x128xf32>
    %c0_90 = arith.constant 0 : index
    %c0_91 = arith.constant 0 : index
    %c0_92 = arith.constant 0 : index
    %150 = vector.load %arg24[%c0_90, %c0_91, %c0_92] : memref<1x1x128xf32, #tpu.memory_space<vmem>>, vector<1x1x128xf32>
    %151 = vector.shape_cast %150 : vector<1x1x128xf32> to vector<1x128xf32>
    %152 = tpu.concatenate %134, %140 in 1 : vector<16x128xf32>, vector<16x128xf32> -> vector<16x256xf32>
    %153 = arith.truncf %152 : vector<16x256xf32> to vector<16x256xbf16>
    %c0_93 = arith.constant 0 : index
    %c0_94 = arith.constant 0 : index
    %c0_95 = arith.constant 0 : index
    %154 = vector.load %arg23[%c0_93, %c0_94, %c0_95] : memref<1x256x128xbf16, #tpu.memory_space<vmem>>, vector<1x256x128xbf16>
    %155 = vector.shape_cast %154 : vector<1x256x128xbf16> to vector<256x128xbf16>
    %cst_96 = arith.constant dense<0.000000e+00> : vector<16x128xf32>
    %156 = tpu.matmul %153, %155, %cst_96 {dimension_numbers = #tpu.dot_dimension_numbers<[1], [0], [0], [1], [0, 0, 1, 1], [], []>} : vector<16x256xbf16>, vector<256x128xbf16>, vector<16x128xf32> -> vector<16x128xf32>
    %157 = vector.broadcast %151 : vector<1x128xf32> to vector<16x128xf32>
    %158 = arith.addf %157, %156 : vector<16x128xf32>
    %c1_i32_97 = arith.constant 1 : i32
    %159 = tpu.dynamic_rotate %158 by %c1_i32_97 dim 0 : vector<16x128xf32>, i32 -> vector<16x128xf32>
    %160 = vector.broadcast %0 : vector<16x1xf32> to vector<16x128xf32>
    %161 = arith.mulf %159, %160 : vector<16x128xf32>
    %c15_i32_98 = arith.constant 15 : i32
    %162 = tpu.dynamic_rotate %149 by %c15_i32_98 dim 0 : vector<16x128xf32>, i32 -> vector<16x128xf32>
    %163 = vector.broadcast %1 : vector<16x1xf32> to vector<16x128xf32>
    %164 = arith.mulf %162, %163 : vector<16x128xf32>
    %c0_99 = arith.constant 0 : index
    %c0_100 = arith.constant 0 : index
    %c0_101 = arith.constant 0 : index
    %165 = vector.load %arg26[%c0_99, %c0_100, %c0_101] : memref<1x1x128xf32, #tpu.memory_space<vmem>>, vector<1x1x128xf32>
    %166 = vector.shape_cast %165 : vector<1x1x128xf32> to vector<1x128xf32>
    %167 = tpu.concatenate %161, %149, %158 in 1 : vector<16x128xf32>, vector<16x128xf32>, vector<16x128xf32> -> vector<16x384xf32>
    %168 = arith.truncf %167 : vector<16x384xf32> to vector<16x384xbf16>
    %c0_102 = arith.constant 0 : index
    %c0_103 = arith.constant 0 : index
    %c0_104 = arith.constant 0 : index
    %169 = vector.load %arg25[%c0_102, %c0_103, %c0_104] : memref<1x384x128xbf16, #tpu.memory_space<vmem>>, vector<1x384x128xbf16>
    %170 = vector.shape_cast %169 : vector<1x384x128xbf16> to vector<384x128xbf16>
    %cst_105 = arith.constant dense<0.000000e+00> : vector<16x128xf32>
    %171 = tpu.matmul %168, %170, %cst_105 {dimension_numbers = #tpu.dot_dimension_numbers<[1], [0], [0], [1], [0, 0, 1, 1], [], []>} : vector<16x384xbf16>, vector<384x128xbf16>, vector<16x128xf32> -> vector<16x128xf32>
    %172 = vector.broadcast %166 : vector<1x128xf32> to vector<16x128xf32>
    %173 = arith.addf %172, %171 : vector<16x128xf32>
    %c0_106 = arith.constant 0 : index
    %c0_107 = arith.constant 0 : index
    %c0_108 = arith.constant 0 : index
    %174 = vector.load %arg26[%c0_106, %c0_107, %c0_108] : memref<1x1x128xf32, #tpu.memory_space<vmem>>, vector<1x1x128xf32>
    %175 = vector.shape_cast %174 : vector<1x1x128xf32> to vector<1x128xf32>
    %176 = tpu.concatenate %149, %158, %164 in 1 : vector<16x128xf32>, vector<16x128xf32>, vector<16x128xf32> -> vector<16x384xf32>
    %177 = arith.truncf %176 : vector<16x384xf32> to vector<16x384xbf16>
    %c0_109 = arith.constant 0 : index
    %c0_110 = arith.constant 0 : index
    %c0_111 = arith.constant 0 : index
    %178 = vector.load %arg25[%c0_109, %c0_110, %c0_111] : memref<1x384x128xbf16, #tpu.memory_space<vmem>>, vector<1x384x128xbf16>
    %179 = vector.shape_cast %178 : vector<1x384x128xbf16> to vector<384x128xbf16>
    %cst_112 = arith.constant dense<0.000000e+00> : vector<16x128xf32>
    %180 = tpu.matmul %177, %179, %cst_112 {dimension_numbers = #tpu.dot_dimension_numbers<[1], [0], [0], [1], [0, 0, 1, 1], [], []>} : vector<16x384xbf16>, vector<384x128xbf16>, vector<16x128xf32> -> vector<16x128xf32>
    %181 = vector.broadcast %175 : vector<1x128xf32> to vector<16x128xf32>
    %182 = arith.addf %181, %180 : vector<16x128xf32>
    %183 = tpu.concatenate %173, %182 in 1 : vector<16x128xf32>, vector<16x128xf32> -> vector<16x256xf32>
    %c0_113 = arith.constant 0 : index
    %c0_114 = arith.constant 0 : index
    %c0_115 = arith.constant 0 : index
    %184 = vector.load %arg27[%c0_113, %c0_114, %c0_115] : memref<1x16x256xf32, #tpu.memory_space<vmem>>, vector<1x16x256xf32>
    %185 = vector.shape_cast %184 : vector<1x16x256xf32> to vector<16x256xf32>
    %186 = vector.shape_cast %183 : vector<16x256xf32> to vector<1x16x256xf32>
    tpu.vector_store %arg27[%c0_113, %c0_114, %c0_115], %186 {strides = array<i32>} : memref<1x16x256xf32, #tpu.memory_space<vmem>>, vector<1x16x256xf32>,
    %187 = vector.extract_strided_slice %3 {offsets = [0, 128], sizes = [16, 128], strides = [1, 1]} : vector<16x512xf32> to vector<16x128xf32>
    %188 = arith.subf %173, %187 : vector<16x128xf32>
    %189 = vector.extract_strided_slice %3 {offsets = [0, 256], sizes = [16, 128], strides = [1, 1]} : vector<16x512xf32> to vector<16x128xf32>
    %190 = arith.subf %182, %189 : vector<16x128xf32>
    %191 = arith.mulf %188, %188 : vector<16x128xf32>
    %cst_116 = arith.constant dense<0.000000e+00> : vector<16xf32>
    %192 = vector.multi_reduction <add>, %191, %cst_116 [1] : vector<16x128xf32> to vector<16xf32>
    %193 = vector.shape_cast %192 : vector<16xf32> to vector<16x1xf32>
    %cst_117 = arith.constant dense<0.000000e+00> : vector<1xf32>
    %194 = vector.multi_reduction <add>, %193, %cst_117 [0] : vector<16x1xf32> to vector<1xf32>
    %195 = vector.shape_cast %194 : vector<1xf32> to vector<1x1xf32>
    %196 = arith.mulf %190, %190 : vector<16x128xf32>
    %cst_118 = arith.constant dense<0.000000e+00> : vector<16xf32>
    %197 = vector.multi_reduction <add>, %196, %cst_118 [1] : vector<16x128xf32> to vector<16xf32>
    %198 = vector.shape_cast %197 : vector<16xf32> to vector<16x1xf32>
    %cst_119 = arith.constant dense<0.000000e+00> : vector<1xf32>
    %199 = vector.multi_reduction <add>, %198, %cst_119 [0] : vector<16x1xf32> to vector<1xf32>
    %200 = vector.shape_cast %199 : vector<1xf32> to vector<1x1xf32>
    %201 = arith.addf %195, %200 : vector<1x1xf32>
    %202 = tpu.iota {dimensions = array<i32: 1>} : vector<1x128xi32>
    %c0_i32 = arith.constant 0 : i32
    %203 = vector.broadcast %c0_i32 : i32 to vector<1x128xi32>
    %204 = arith.cmpi eq, %202, %203 : vector<1x128xi32>
    %cst_120 = arith.constant 0.000000e+00 : f32
    %205 = vector.shape_cast %91 : vector<1x1xf32> to vector<1x1xf32>
    %206 = vector.broadcast %205 : vector<1x1xf32> to vector<1x128xf32>
    %207 = vector.broadcast %cst_120 : f32 to vector<1x128xf32>
    %208 = arith.select %204, %206, %207 : vector<1x128xi1>, vector<1x128xf32>
    %c1_i32_121 = arith.constant 1 : i32
    %209 = vector.broadcast %c1_i32_121 : i32 to vector<1x128xi32>
    %210 = arith.cmpi eq, %202, %209 : vector<1x128xi32>
    %cst_122 = arith.constant 0.000000e+00 : f32
    %211 = vector.shape_cast %201 : vector<1x1xf32> to vector<1x1xf32>
    %212 = vector.broadcast %211 : vector<1x1xf32> to vector<1x128xf32>
    %213 = vector.broadcast %cst_122 : f32 to vector<1x128xf32>
    %214 = arith.select %210, %212, %213 : vector<1x128xi1>, vector<1x128xf32>
    %215 = arith.addf %208, %214 : vector<1x128xf32>
    %c0_123 = arith.constant 0 : index
    %c0_124 = arith.constant 0 : index
    %c0_125 = arith.constant 0 : index
    %c0_126 = arith.constant 0 : index
    %216 = vector.load %arg28[%c0_123, %c0_124, %c0_125, %c0_126] : memref<1x1x1x128xf32, #tpu.memory_space<vmem>>, vector<1x1x1x128xf32>
    %217 = vector.shape_cast %216 : vector<1x1x1x128xf32> to vector<1x128xf32>
    %218 = vector.shape_cast %215 : vector<1x128xf32> to vector<1x1x1x128xf32>
    tpu.vector_store %arg28[%c0_123, %c0_124, %c0_125, %c0_126], %218 {strides = array<i32>} : memref<1x1x1x128xf32, #tpu.memory_space<vmem>>, vector<1x1x1x128xf32>,
    return
  }
  func.func @transform_0(%arg0: i32, %arg1: i32) -> (i32, i32, i32) {
    %c0_i32 = arith.constant 0 : i32
    %c0_i32_0 = arith.constant 0 : i32
    return %arg0, %arg1, %c0_i32 : i32, i32, i32
  }
  func.func @transform_1(%arg0: i32, %arg1: i32) -> (i32, i32) {
    %c0_i32 = arith.constant 0 : i32
    %c0_i32_0 = arith.constant 0 : i32
    %c0_i32_1 = arith.constant 0 : i32
    return %c0_i32, %c0_i32_0 : i32, i32
  }
  func.func @transform_2(%arg0: i32, %arg1: i32) -> (i32, i32) {
    %c0_i32 = arith.constant 0 : i32
    %c0_i32_0 = arith.constant 0 : i32
    %c0_i32_1 = arith.constant 0 : i32
    return %c0_i32, %c0_i32_0 : i32, i32
  }
  func.func @transform_3(%arg0: i32, %arg1: i32) -> (i32, i32, i32) {
    %c0_i32 = arith.constant 0 : i32
    %c0_i32_0 = arith.constant 0 : i32
    %c0_i32_1 = arith.constant 0 : i32
    return %arg0, %c0_i32, %c0_i32_0 : i32, i32, i32
  }
  func.func @transform_4(%arg0: i32, %arg1: i32) -> (i32, i32, i32) {
    %c0_i32 = arith.constant 0 : i32
    %c0_i32_0 = arith.constant 0 : i32
    %c0_i32_1 = arith.constant 0 : i32
    return %arg0, %c0_i32, %c0_i32_0 : i32, i32, i32
  }
  func.func @transform_5(%arg0: i32, %arg1: i32) -> (i32, i32, i32) {
    %c0_i32 = arith.constant 0 : i32
    %c0_i32_0 = arith.constant 0 : i32
    %c0_i32_1 = arith.constant 0 : i32
    return %arg0, %c0_i32, %c0_i32_0 : i32, i32, i32
  }
  func.func @transform_6(%arg0: i32, %arg1: i32) -> (i32, i32, i32) {
    %c0_i32 = arith.constant 0 : i32
    %c0_i32_0 = arith.constant 0 : i32
    %c0_i32_1 = arith.constant 0 : i32
    return %arg0, %c0_i32, %c0_i32_0 : i32, i32, i32
  }
  func.func @transform_7(%arg0: i32, %arg1: i32) -> (i32, i32, i32) {
    %c0_i32 = arith.constant 0 : i32
    %c0_i32_0 = arith.constant 0 : i32
    %c0_i32_1 = arith.constant 0 : i32
    return %arg0, %c0_i32, %c0_i32_0 : i32, i32, i32
  }
  func.func @transform_8(%arg0: i32, %arg1: i32) -> (i32, i32, i32) {
    %c0_i32 = arith.constant 0 : i32
    %c0_i32_0 = arith.constant 0 : i32
    %c0_i32_1 = arith.constant 0 : i32
    return %arg0, %c0_i32, %c0_i32_0 : i32, i32, i32
  }
  func.func @transform_9(%arg0: i32, %arg1: i32) -> (i32, i32, i32) {
    %c0_i32 = arith.constant 0 : i32
    %c0_i32_0 = arith.constant 0 : i32
    %c0_i32_1 = arith.constant 0 : i32
    return %arg0, %c0_i32, %c0_i32_0 : i32, i32, i32
  }
  func.func @transform_10(%arg0: i32, %arg1: i32) -> (i32, i32, i32) {
    %c0_i32 = arith.constant 0 : i32
    %c0_i32_0 = arith.constant 0 : i32
    %c0_i32_1 = arith.constant 0 : i32
    return %arg0, %c0_i32, %c0_i32_0 : i32, i32, i32
  }
  func.func @transform_11(%arg0: i32, %arg1: i32) -> (i32, i32, i32) {
    %c0_i32 = arith.constant 0 : i32
    %c0_i32_0 = arith.constant 0 : i32
    %c0_i32_1 = arith.constant 0 : i32
    return %arg0, %c0_i32, %c0_i32_0 : i32, i32, i32
  }
  func.func @transform_12(%arg0: i32, %arg1: i32) -> (i32, i32, i32) {
    %c0_i32 = arith.constant 0 : i32
    %c0_i32_0 = arith.constant 0 : i32
    %c0_i32_1 = arith.constant 0 : i32
    return %arg0, %c0_i32, %c0_i32_0 : i32, i32, i32
  }
  func.func @transform_13(%arg0: i32, %arg1: i32) -> (i32, i32, i32) {
    %c0_i32 = arith.constant 0 : i32
    %c0_i32_0 = arith.constant 0 : i32
    %c0_i32_1 = arith.constant 0 : i32
    return %arg0, %c0_i32, %c0_i32_0 : i32, i32, i32
  }
  func.func @transform_14(%arg0: i32, %arg1: i32) -> (i32, i32, i32) {
    %c0_i32 = arith.constant 0 : i32
    %c0_i32_0 = arith.constant 0 : i32
    %c0_i32_1 = arith.constant 0 : i32
    return %arg0, %c0_i32, %c0_i32_0 : i32, i32, i32
  }
  func.func @transform_15(%arg0: i32, %arg1: i32) -> (i32, i32, i32) {
    %c0_i32 = arith.constant 0 : i32
    %c0_i32_0 = arith.constant 0 : i32
    %c0_i32_1 = arith.constant 0 : i32
    return %arg0, %c0_i32, %c0_i32_0 : i32, i32, i32
  }
  func.func @transform_16(%arg0: i32, %arg1: i32) -> (i32, i32, i32) {
    %c0_i32 = arith.constant 0 : i32
    %c0_i32_0 = arith.constant 0 : i32
    %c0_i32_1 = arith.constant 0 : i32
    return %arg0, %c0_i32, %c0_i32_0 : i32, i32, i32
  }
  func.func @transform_17(%arg0: i32, %arg1: i32) -> (i32, i32, i32) {
    %c0_i32 = arith.constant 0 : i32
    %c0_i32_0 = arith.constant 0 : i32
    %c0_i32_1 = arith.constant 0 : i32
    return %arg0, %c0_i32, %c0_i32_0 : i32, i32, i32
  }
  func.func @transform_18(%arg0: i32, %arg1: i32) -> (i32, i32, i32) {
    %c0_i32 = arith.constant 0 : i32
    %c0_i32_0 = arith.constant 0 : i32
    %c0_i32_1 = arith.constant 0 : i32
    return %arg0, %c0_i32, %c0_i32_0 : i32, i32, i32
  }
  func.func @transform_19(%arg0: i32, %arg1: i32) -> (i32, i32, i32) {
    %c0_i32 = arith.constant 0 : i32
    %c0_i32_0 = arith.constant 0 : i32
    %c0_i32_1 = arith.constant 0 : i32
    return %arg0, %c0_i32, %c0_i32_0 : i32, i32, i32
  }
  func.func @transform_20(%arg0: i32, %arg1: i32) -> (i32, i32, i32) {
    %c0_i32 = arith.constant 0 : i32
    %c0_i32_0 = arith.constant 0 : i32
    %c0_i32_1 = arith.constant 0 : i32
    return %arg0, %c0_i32, %c0_i32_0 : i32, i32, i32
  }
  func.func @transform_21(%arg0: i32, %arg1: i32) -> (i32, i32, i32) {
    %c0_i32 = arith.constant 0 : i32
    %c0_i32_0 = arith.constant 0 : i32
    %c0_i32_1 = arith.constant 0 : i32
    return %arg0, %c0_i32, %c0_i32_0 : i32, i32, i32
  }
  func.func @transform_22(%arg0: i32, %arg1: i32) -> (i32, i32, i32) {
    %c0_i32 = arith.constant 0 : i32
    %c0_i32_0 = arith.constant 0 : i32
    %c0_i32_1 = arith.constant 0 : i32
    return %arg0, %c0_i32, %c0_i32_0 : i32, i32, i32
  }
  func.func @transform_23(%arg0: i32, %arg1: i32) -> (i32, i32, i32) {
    %c0_i32 = arith.constant 0 : i32
    %c0_i32_0 = arith.constant 0 : i32
    %c0_i32_1 = arith.constant 0 : i32
    return %arg0, %c0_i32, %c0_i32_0 : i32, i32, i32
  }
  func.func @transform_24(%arg0: i32, %arg1: i32) -> (i32, i32, i32) {
    %c0_i32 = arith.constant 0 : i32
    %c0_i32_0 = arith.constant 0 : i32
    %c0_i32_1 = arith.constant 0 : i32
    return %arg0, %c0_i32, %c0_i32_0 : i32, i32, i32
  }
  func.func @transform_25(%arg0: i32, %arg1: i32) -> (i32, i32, i32) {
    %c0_i32 = arith.constant 0 : i32
    %c0_i32_0 = arith.constant 0 : i32
    return %arg0, %arg1, %c0_i32 : i32, i32, i32
  }
  func.func @transform_26(%arg0: i32, %arg1: i32) -> (i32, i32, i32, i32) {
    %c0_i32 = arith.constant 0 : i32
    %c0_i32_0 = arith.constant 0 : i32
    %c0_i32_1 = arith.constant 0 : i32
    return %arg0, %arg1, %c0_i32, %c0_i32_0 : i32, i32, i32, i32
  }
}

</mosaic_0001>

<bundles_post_ra>
// kernel: run.1
= control target key start
LH: loop header
LB: loop body
LE: loop exit
PB: predicated region body
PF: predicated region fallthrough
CT: control target
= control target key end

     0   :  { %s6791_s0 = inlined_call_operand.vmem [shape: f32[2,16,512], index: 0, kind: input, shape index: {}]   ;;  %s6792_s1 = inlined_call_operand.vmem [shape: f32[16,1], index: 1, kind: input, shape index: {}]   ;;  %s6793_s2 = inlined_call_operand.vmem [shape: f32[16,1], index: 2, kind: input, shape index: {}]   ;;  %s6794_s3 = inlined_call_operand.vmem [shape: bf16[2,512,128], index: 3, kind: input, shape index: {}]   ;;  %s6795_s4 = inlined_call_operand.vmem [shape: f32[2,1,128], index: 4, kind: input, shape index: {}, may-alias: {4,6,8,15,17,19,22}]   ;;  %s6796_s5 = inlined_call_operand.vmem [shape: bf16[2,384,128], index: 5, kind: input, shape index: {}]   ;;  %s6797_s6 = inlined_call_operand.vmem [shape: f32[2,1,128], index: 6, kind: input, shape index: {}, may-alias: {4,6,8,15,17,19,22}]   ;;  %s6798_s7 = inlined_call_operand.vmem [shape: bf16[2,128,128], index: 7, kind: input, shape index: {}]   ;;  %s6799_s8 = inlined_call_operand.vmem [shape: f32[2,1,128], index: 8, kind: input, shape index: {}, may-alias: {4,6,8,15,17,19,22}]   ;;  %s6800_s9 = inlined_call_operand.vmem [shape: bf16[2,384,128], index: 9, kind: input, shape index: {}]   ;;  %s6801_s10 = inlined_call_operand.vmem [shape: f32[2,1,128], index: 10, kind: input, shape index: {}]   ;;  %s6802_s11 = inlined_call_operand.hbm [shape: bf16[2,128,128], index: 11, kind: input, shape index: {}]   ;;  %s6803_s12 = inlined_call_operand.vmem [shape: f32[2,128,128], index: 12, kind: input, shape index: {}]   ;;  %s6804_s13 = inlined_call_operand.vmem [shape: f32[2,1,128], index: 13, kind: input, shape index: {}]   ;;  %s6805_s14 = inlined_call_operand.vmem [shape: bf16[2,384,128], index: 14, kind: input, shape index: {}]   ;;  %s6806_s15 = inlined_call_operand.vmem [shape: f32[2,1,128], index: 15, kind: input, shape index: {}, may-alias: {4,6,8,15,17,19,22}]   ;;  %s6807_s16 = inlined_call_operand.vmem [shape: bf16[2,384,128], index: 16, kind: input, shape index: {}]   ;;  %s6808_s17 = inlined_call_operand.vmem [shape: f32[2,1,128], index: 17, kind: input, shape index: {}, may-alias: {4,6,8,15,17,19,22}]   ;;  %s6809_s18 = inlined_call_operand.hbm [shape: bf16[2,128,128], index: 18, kind: input, shape index: {}]   ;;  %s6810_s19 = inlined_call_operand.vmem [shape: f32[2,1,128], index: 19, kind: input, shape index: {}, may-alias: {4,6,8,15,17,19,22}]   ;;  %s6811_s20 = inlined_call_operand.vmem [shape: bf16[2,256,128], index: 20, kind: input, shape index: {}]   ;;  %s6812_s21 = inlined_call_operand.hbm [shape: bf16[2,256,128], index: 21, kind: input, shape index: {}]   ;;  %s6813_s22 = inlined_call_operand.vmem [shape: f32[2,1,128], index: 22, kind: input, shape index: {}, may-alias: {4,6,8,15,17,19,22}]   ;;  %s6814_s23 = inlined_call_operand.vmem [shape: bf16[2,384,128], index: 23, kind: input, shape index: {}]   ;;  %s6815_s24 = inlined_call_operand.vmem [shape: f32[2,1,128], index: 24, kind: input, shape index: {}]   ;;  %s6816_s25 = inlined_call_operand.vmem [shape: f32[2,16,256], index: 25, kind: output, shape index: {0}]   ;;  %s6817_s26 = inlined_call_operand.vmem [shape: f32[2,1,1,128], index: 26, kind: output, shape index: {1}]  }
   0x1   :  { %6825 = sst [smem:[#allocation12_spill]] %s6791_s0 }
   0x2   :  { %6826 = sst [smem:[#allocation13_spill]] %s6792_s1 }
   0x3   :  { %6827 = sst [smem:[#allocation14_spill]] %s6793_s2 }
   0x4   :  { %6828 = sst [smem:[#allocation15_spill]] %s6794_s3 }
   0x5   :  { %6829 = sst [smem:[#allocation16_spill]] %s6795_s4 }
   0x6   :  { %6830 = sst [smem:[#allocation17_spill]] %s6796_s5 }
   0x7   :  { %6831 = sst [smem:[#allocation18_spill]] %s6797_s6 }
   0x8   :  { %6832 = sst [smem:[#allocation19_spill]] %s6798_s7 }
   0x9   :  { %6833 = sst [smem:[#allocation20_spill]] %s6799_s8 }
   0xa   :  { %6834 = sst [smem:[#allocation21_spill]] %s6800_s9 }
   0xb   :  { %6835 = sst [smem:[#allocation22_spill]] %s6801_s10 }
   0xc   :  { %6836 = sst [smem:[#allocation23_spill]] %s6802_s11 }
   0xd   :  { %6837 = sst [smem:[#allocation24_spill]] %s6808_s17 }
   0xe   :  { %6838 = sst [smem:[#allocation25_spill]] %s6809_s18 }
   0xf   :  { %6839 = sst [smem:[#allocation26_spill]] %s6810_s19 }
  0x10   :  { %6840 = sst [smem:[#allocation27_spill]] %s6813_s22 }
  0x11   :  { %6841 = sst [smem:[#allocation28_spill]] %s6814_s23 }
  0x12   :  { %6842 = sst [smem:[#allocation29_spill]] %s6815_s24 }
  0x13   :  { %6843 = sst [smem:[#allocation30_spill]] %s6816_s25 }
  0x14   :  { %6844 = sst [smem:[#allocation31_spill]] %s6817_s26 }
  0x15   :  { %32 = vsyncpa [#allocation3], 0 }
  0x16   :  { %34 = vsyncpa [#allocation3 + $0x1], 0 }
  0x17   :  { %35 = vsyncpa [#allocation5], 0 }
  0x18   :  { %37 = vsyncpa [#allocation5 + $0x1], 0  ;;  %s5941_s27 = smov 0   ;;  %s5943_s3 = smov 0  }
  0x19   :  { %s5945_s7 = smov 0   ;;  %s5947_s28 = smov 0  }
  0x1a   :  { %s5949_s8 = smov 0   ;;  %s5951_s4 = smov 0  }
  0x1b LB: > { %6845 = sst [smem:[#allocation9_spill]] %s5783_s7  ;;  %s6820_s29 = sadd.s32 4294967295, %s5795_s4   ;;  %s5795_s4 = sphi %s5951_s4, %s43_s4   ;;  %s5791_s8 = sphi %s5949_s8, %s6879_s8   ;;  %s5787_s28 = sphi %s5947_s28, %s6878_s28   ;;  %s5783_s7 = sphi %s5945_s7, %s6874_s7   ;;  %s5779_s3 = sphi %s5943_s3, %s6877_s3   ;;  %s5775_s27 = sphi %s5941_s27, %s6876_s27  }
  0x1c   : > { %s55_s0 = sadd.s32 1, %s5791_s8  ;;  %s340_s9 = sadd.s32 1, %s5783_s7 }
  0x1d   : > { %p57_p0 = scmp.ge.s32.totalorder %s55_s0, 2  ;;  %p347_p1 = scmp.ne.s32.totalorder %s5783_s7, %s5779_s3 }
  0x1e   : > { %p348_p2 = scmp.eq.s32.totalorder %s5795_s4, 0  ;;  %p353_p4 = scmp.ne.s32.totalorder %s5779_s3, %s5775_s27 }
  0x1f   : > { %s6881_s0 = smov (%p57_p0, %s55_s0), 0  ;;  %p354_p5 = scmp.eq.s32.totalorder %s6820_s29, 0 }
  0x20   : > { %6846 = sst [smem:[#allocation10_spill]] %s6881_s0  ;;  %p349_p3 = por %p348_p2, %p347_p1 }
  0x21   : > { %s337_s30 = ssub.s32 %s5791_s8, %s6881_s0  ;;  %p5982_p7 = por %p354_p5, %p353_p4 }
  0x22   : > { %p338_p6 = scmp.eq.s32.totalorder %s337_s30, 0  ;;  %p5388_p8 = scmp.lt.s32.totalorder %s5795_s4, 2 }
  0x23   : > { %s5991_s10 = sand.u32 1, %s5783_s7   ;;  %s4828_s6 = sshll.u32 %s5791_s8, 10 }
  0x24   : > { %s5988_s5 = scalar_select %p338_p6, %s5783_s7, %s340_s9  }
  0x25   : > { %s4574_s1 = sshll.u32 %s5991_s10, 6  ;;  %p5995_p9 = pnand %p5388_p8, %p349_p3 }
  0x26   : > { %6848 = sst [smem:[#allocation11_spill]] %s5988_s5  ;;  %s910_s30 = sand.u32 1, %s5795_s4  }
  0x27   : > { %s6850_s18 = sld [smem:[#allocation25_spill]]  ;;  %s914_s9 = scalar_lea.vmem [#allocation4], %s4574_s1 }
  0x28   : > { %s921_s5 = sshll.u32 %s914_s9, 4  ;;  %p4583_p10 = scmp.ge.s32.totalorder %s5795_s4, 1  ;;  %s922_s5 = int_to_ptr.vmem [resolvable:$true] %s921_s5 }
  0x29   : > { %s6008_s7 = scalar_lea.sflag [#allocation5], %s910_s30  ;;  %p5659_p11 = pneg %p5995_p9 }
  0x2a   : > { %s5670_s25 = scalar_lea.vmem %s922_s5, 1024  ;;  %s5797_s24 = smov [#allocation4]  }
  0x2b   : > { %p5671_p12 = scmp.ne.s32.totalorder %s922_s5, %s5670_s25  ;;  %s5675_s22 = sshll.u32 %s5797_s24, 4  ;;  %s5676_s22 = int_to_ptr.vmem [resolvable:$false] %s5675_s22 }
  0x2c   : > { %s5677_s29 = scalar_lea.vmem %s5676_s22, 2048  ;;  %p5678_p1 = scmp.lt.s32.totalorder %s922_s5, %s5676_s22 }
  0x2d   : > { %s920_s26 = scalar_lea.hbm %s6850_s18, %s4828_s6  ;;  %p5673_p13 = pnand %p5671_p12, %p5659_p11 }
  0x2e   : > { %p5679_p2 = scmp.lt.s32.totalorder %s5677_s29, %s5670_s25 }
  0x2f   : > { %p5674_p0 = pneg %p5673_p13 }
  0x30   : > { %p5680_p3 = por %p5679_p2, %p5678_p1 }
  0x32   : > { %p5681_p4 = pnand %p5680_p3, %p5674_p0 }
  0x34   : > { %5684 = shalt.err (!%p5681_p4)
}
  0x35   : > { %s6823_s0 = smov 64   ;;  %s5799_s30 = smov 4  }
  0x36   : > { %5384 = dma.hbm_to_vmem [thread:$0]  (!%p5995_p9), %s920_s26, 1024, %s922_s5, %s6008_s7, %s6823_s0, %s6823_s0, %s5799_s30  }
  0x37   : > { %p984_p5 = scmp.lt.s32.totalorder %s5795_s4, 3  ;;  %s6852_s11 = sld [smem:[#allocation23_spill]] }
  0x38   : > { %s851_s29 = scalar_lea.vmem [#allocation2], %s4574_s1  ;;  %s4580_s19 = sshll.u32 %s5991_s10, 7 }
  0x39   : > { %p6024_p6 = pnand %p4583_p10, %p984_p5  ;;  %s858_s18 = sshll.u32 %s851_s29, 4  ;;  %s859_s18 = int_to_ptr.vmem [resolvable:$true] %s858_s18 }
  0x3a   : > { %s848_s23 = scalar_lea.sflag [#allocation3], %s5991_s10  ;;  %s5698_s17 = scalar_lea.vmem %s859_s18, 1024 }
  0x3b   : > { %p5699_p8 = scmp.ne.s32.totalorder %s859_s18, %s5698_s17  ;;  %s5800_s26 = smov [#allocation2]  }
  0x3c   : > { %s5703_s5 = sshll.u32 %s5800_s26, 4  ;;  %s5704_s5 = int_to_ptr.vmem [resolvable:$false] %s5703_s5 }
  0x3d   : > { %s857_s9 = scalar_lea.hbm %s6852_s11, %s4828_s6  ;;  %p5701_p12 = pnand %p5699_p8, %p5659_p11 }
  0x3e   : > { %s5705_s0 = scalar_lea.vmem %s5704_s5, 2048  ;;  %p5706_p13 = scmp.lt.s32.totalorder %s859_s18, %s5704_s5 }
  0x3f   : > { %p5702_p10 = pneg %p5701_p12  ;;  %p5707_p0 = scmp.lt.s32.totalorder %s5705_s0, %s5698_s17 }
  0x41   : > { %p5708_p1 = por %p5707_p0, %p5706_p13 }
  0x43   : > { %p5709_p2 = pnand %p5708_p1, %p5702_p10 }
  0x45   : > { %5712 = shalt.err (!%p5709_p2)
}
  0x46   : > { %s6853_s6 = smov 64   ;;  %s4830_s10 = sshll.u32 %s5791_s8, 11 }
  0x47   : > { %5381 = dma.hbm_to_vmem [thread:$0]  (!%p5995_p9), %s857_s9, 1024, %s859_s18, %s848_s23, %s6853_s6, %s6853_s6, %s5799_s30  }
  0x48   : > { %s955_s25 = scalar_lea.hbm %s6812_s21, %s4830_s10  ;;  %s949_s29 = scalar_lea.vmem [#allocation6], %s4580_s19 }
  0x49   : > { %s956_s26 = sshll.u32 %s949_s29, 4  ;;  %s5801_s0 = smov [#allocation6]   ;;  %s957_s26 = int_to_ptr.vmem [resolvable:$true] %s956_s26 }
  0x4a   : > { %s5726_s17 = scalar_lea.vmem %s957_s26, 2048  ;;  %s5731_s5 = sshll.u32 %s5801_s0, 4  ;;  %s5732_s5 = int_to_ptr.vmem [resolvable:$false] %s5731_s5 }
  0x4b   : > { %p5727_p3 = scmp.ne.s32.totalorder %s957_s26, %s5726_s17  ;;  %s5733_s11 = scalar_lea.vmem %s5732_s5, 4096 }
  0x4c   : > { %p5734_p8 = scmp.lt.s32.totalorder %s957_s26, %s5732_s5  ;;  %p5735_p12 = scmp.lt.s32.totalorder %s5733_s11, %s5726_s17 }
  0x4d   : > { %p5729_p4 = pnand %p5727_p3, %p5659_p11 }
  0x4e   : > { %p5736_p10 = por %p5735_p12, %p5734_p8 }
  0x4f   : > { %p5730_p5 = pneg %p5729_p4 }
  0x51   : > { %p5737_p13 = pnand %p5736_p10, %p5730_p5 }
  0x53   : > { %5740 = shalt.err (!%p5737_p13)
}
  0x54   : > { %5387 = dma.hbm_to_vmem [thread:$0]  (!%p5995_p9), %s955_s25, 2048, %s957_s26, %s6008_s7, %s6853_s6, %s6853_s6, %s5799_s30  }
  0x55   : > { %988 = sbr.rel (%p6024_p6) target bundleno = 3050 (0xbea), region = 120  ;;  %s6061_s18 = sand.u32 (!%p6024_p6), 1, %s5779_s3  }
  0x56   : > { %s4584_s11 = sshll.u32 (!%p6024_p6), %s6061_s18, 6  ;;  %s991_s19 = scalar_lea.sflag (!%p6024_p6), [#allocation3], %s6061_s18 }
  0x57   : > { %s6065_s23 = scalar_lea.vmem (!%p6024_p6), [#allocation2], %s4584_s11 }
  0x5a   : > { %5766 = dma.done.wait (%p5982_p7), %s991_s19, 1024  }
  0x5b   : > { %5768 = vsyncadd (%p5982_p7), %s991_s19, 4294966272  ;;  %s6854_s7 = sadd.s32 4294967295, %s5795_s4   ;;  %s6073_s22 = scalar_lea.vmem [#allocation4], %s4584_s11 }
  0x5c   : > { %s999_s27 = sand.u32 1, %s6854_s7  }
  0x5d   : > { %s1000_s30 = scalar_lea.sflag [#allocation5], %s999_s27 }
  0x5e   : > { %5770 = dma.done.wait (%p5982_p7), %s1000_s30, 3072  }
  0x5f   : > { %5772 = vsyncadd (%p5982_p7), %s1000_s30, 4294964224  ;;  %p1188_p9 = scmp.lt.s32.totalorder %s5787_s28, 1  ;;  %v5802_v0 = vmov 0   ;;  %s6855_s1 = sld [smem:[#allocation15_spill]]  ;;  %v5803_v45 = vmov 0.0   ;;  %vm5804_vm0 = vmmov 0  }
  0x60   : > { %5443 = vset.pattern.permute.xlu0 %v5802_v0  ;;  %5444 = vset.pattern.permute.xlu1 %v5802_v0  ;;  %s6856_s26 = sld [smem:[#allocation12_spill]] }
  0x61   : > { %s6883_s28 = smov (!%p1188_p9, %s5787_s28), 1  ;;  %s6857_s19 = sld [smem:[#allocation17_spill]] }
  0x62   : > { %s4832_s9 = sshll.u32 %s6883_s28, 8  ;;  %s4831_s2 = sshll.u32 %s6883_s28, 6 }
  0x63   : > { %s6128_s0 = smul.u32 192, %s6883_s28  ;;  %s6861_s6 = sld [smem:[#allocation16_spill]] }
  0x64   : > { %s6862_s25 = sld [smem:[#allocation21_spill]]  ;;  %s4834_s5 = sshll.u32 %s6883_s28, 7 }
  0x65   : > { %s6087_s24 = scalar_lea.vmem %s6855_s1, %s4832_s9  ;;  %s6858_s9 = sld [smem:[#allocation13_spill]] }
  0x66   : > { %v5445_v1 = vld [vmem:[%s6087_s24 + $0x78] sm:$0xff]   ;;  %v5449_v5 = vld [vmem:[%s6087_s24 + $0x70] sm:$0xff]   ;;  %v5453_v9 = vld [vmem:[%s6087_s24 + $0x68] sm:$0xff]   ;;  %s6125_s17 = scalar_lea.vmem %s6856_s26, %s4831_s2  ;;  %s6859_s1 = sld [smem:[#allocation14_spill]] }
  0x67   : > { %v5446_v2 = vld [vmem:[%s6087_s24 + $0xf8] sm:$0xff]   ;;  %4837 = vmatprep.subr.bf16.mxu0 %v5445_v1  ;;  %v5450_v6 = vld [vmem:[%s6087_s24 + $0xf0] sm:$0xff]   ;;  %v5454_v10 = vld [vmem:[%s6087_s24 + $0xe8] sm:$0xff]   ;;  %s6142_s7 = scalar_lea.vmem %s6857_s19, %s6128_s0  ;;  %s6860_s19 = sld [smem:[#allocation19_spill]] }
  0x68   : > { %v5447_v3 = vld [vmem:[%s6087_s24 + $0x38] sm:$0xff]   ;;  %4859 = vmatprep.subr.bf16.mxu1 %v5446_v2  ;;  %v5451_v7 = vld [vmem:[%s6087_s24 + $0x30] sm:$0xff]   ;;  %v5455_v11 = vld [vmem:[%s6087_s24 + $0x28] sm:$0xff]   ;;  %s6863_s11 = sld [smem:[#allocation18_spill]]  ;;  %s1237_s26 = scalar_lea.vmem %s6804_s13, %s6883_s28 }
  0x69   : > { %v5448_v4 = vld [vmem:[%s6087_s24 + $0xb8] sm:$0xff]   ;;  %4838 = vmatpush3.bf16.msra.mxu0 %v5447_v3  ;;  %v5452_v8 = vld [vmem:[%s6087_s24 + $0xb0] sm:$0xff]   ;;  %v5456_v12 = vld [vmem:[%s6087_s24 + $0xa8] sm:$0xff]   ;;  %s1205_s10 = scalar_lea.vmem %s6861_s6, %s6883_s28  ;;  %s6864_s30 = sld [smem:[#allocation20_spill]] }
  0x6a   : > { %4860 = vmatpush3.bf16.msra.mxu1 %v5448_v4  ;;  %4839 = vmatprep.subr.bf16.mxu0 %v5449_v5  ;;  %v5457_v13 = vld [vmem:[%s6087_s24 + $0x60] sm:$0xff]   ;;  %v5461_v17 = vld [vmem:[%s6087_s24 + $0x58] sm:$0xff]   ;;  %v5465_v21 = vld [vmem:[%s6087_s24 + $0x50] sm:$0xff]   ;;  %s6257_s29 = scalar_lea.vmem %s6862_s25, %s6128_s0 }
  0x6b   : > { %4861 = vmatprep.subr.bf16.mxu1 %v5450_v6  ;;  %v5458_v14 = vld [vmem:[%s6087_s24 + $0xe0] sm:$0xff]   ;;  %v5462_v18 = vld [vmem:[%s6087_s24 + $0xd8] sm:$0xff]   ;;  %v5466_v22 = vld [vmem:[%s6087_s24 + $0xd0] sm:$0xff]  }
  0x6c   : > { %v5459_v15 = vld [vmem:[%s6087_s24 + $0x20] sm:$0xff]   ;;  %v5463_v19 = vld [vmem:[%s6087_s24 + $0x18] sm:$0xff]   ;;  %v5467_v23 = vld [vmem:[%s6087_s24 + $0x10] sm:$0xff]  }
  0x6d   : > { %4840 = vmatpush3.bf16.msra.mxu0 %v5451_v7  ;;  %v5460_v16 = vld [vmem:[%s6087_s24 + $0xa0] sm:$0xff]   ;;  %v5464_v20 = vld [vmem:[%s6087_s24 + $0x98] sm:$0xff]   ;;  %v5468_v24 = vld [vmem:[%s6087_s24 + $0x90] sm:$0xff]   ;;  %s6176_s27 = scalar_lea.vmem %s6860_s19, %s4831_s2  ;;  %s6866_s2 = sld [smem:[#allocation24_spill]] }
  0x6e   : > { %4862 = vmatpush3.bf16.msra.mxu1 %v5452_v8  ;;  %4841 = vmatprep.subr.bf16.mxu0 %v5453_v9  ;;  %v5469_v25 = vld [vmem:[%s6087_s24 + $0x48] sm:$0xff]   ;;  %v5473_v29 = vld [vmem:[%s6087_s24 + $0x40] sm:$0xff]   ;;  %v1298_v35 = vld [vmem:[%s6125_s17 + $0x18] sm:$0xff]  ;;  %s1213_s19 = scalar_lea.vmem %s6863_s11, %s6883_s28  ;;  %s1245_s11 = scalar_lea.vmem %s6806_s15, %s6883_s28 }
  0x6f   : > { %4863 = vmatprep.subr.bf16.mxu1 %v5454_v10  ;;  %v5470_v26 = vld [vmem:[%s6087_s24 + $0xc8] sm:$0xff]   ;;  %v5474_v30 = vld [vmem:[%s6087_s24 + $0xc0] sm:$0xff]   ;;  %v1302_v37 = vld [vmem:[%s6125_s17 + $0x38] sm:$0xff]  ;;  %s1221_s6 = scalar_lea.vmem %s6864_s30, %s6883_s28 }
  0x70   : > { %v5471_v27 = vld [vmem:[%s6087_s24 + $0x8] sm:$0xff]   ;;  %v5475_v31 = vld [vmem:[%s6087_s24] sm:$0xff]   ;;  %v1307_v40 = vpack.c.bf16 %v1302_v37, %v1298_v35  ;;  %v1297_v42 = vld [vmem:[%s6125_s17 + $0x10] sm:$0xff] }
  0x71   : > { %4842 = vmatpush3.bf16.msra.mxu0 %v5455_v11  ;;  %v5472_v28 = vld [vmem:[%s6087_s24 + $0x88] sm:$0xff]   ;;  %v5476_v32 = vld [vmem:[%s6087_s24 + $0x80] sm:$0xff]   ;;  %v1301_v43 = vld [vmem:[%s6125_s17 + $0x30] sm:$0xff]  ;;  %s6865_s24 = sld [smem:[#allocation22_spill]] }
  0x72   : > { %4864 = vmatpush3.bf16.msra.mxu1 %v5456_v12  ;;  %4843 = vmatprep.subr.bf16.mxu0 %v5457_v13  ;;  %v1296_v33 = vld [vmem:[%s6125_s17 + $0x8] sm:$0xff]  ;;  %v1295_v38 = vld [vmem:[%s6125_s17] sm:$0xff]  ;;  %v1306_v46 = vpack.c.bf16 %v1301_v43, %v1297_v42  ;;  %v5477_v50 = vld [vmem:[%s6142_s7 + $0x78] sm:$0xff]  }
  0x73   : > { %4865 = vmatprep.subr.bf16.mxu1 %v5458_v14  ;;  %v1300_v34 = vld [vmem:[%s6125_s17 + $0x28] sm:$0xff]  ;;  %v1299_v39 = vld [vmem:[%s6125_s17 + $0x20] sm:$0xff]  ;;  %1637 = vmatprep.mubr.bf16.mxu1 %v1307_v40  ;;  %v5478_v51 = vld [vmem:[%s6142_s7 + $0x38] sm:$0xff]   ;;  %s1253_s30 = scalar_lea.vmem %s6866_s2, %s6883_s28 }
  0x74   : > { %v1305_v36 = vpack.c.bf16 %v1300_v34, %v1296_v33  ;;  %v1304_v41 = vpack.c.bf16 %v1299_v39, %v1295_v38  ;;  %v1291_v44 = vld [vmem:[%s6858_s9] sm:$0xff]  ;;  %v1292_v48 = vld [vmem:[%s6858_s9 + $0x8] sm:$0xff]  ;;  %v5479_v52 = vld [vmem:[%s6142_s7 + $0xb8] sm:$0xff]  }
  0x75   : > { %4844 = vmatpush3.bf16.msra.mxu0 %v5459_v15  ;;  %1665 = vperm.xlu0 %5443, %v1291_v44   ;;  %v1293_v47 = vld [vmem:[%s6859_s1] sm:$0xff]  ;;  %v1294_v49 = vld [vmem:[%s6859_s1 + $0x8] sm:$0xff]  ;;  %v5480_v53 = vld [vmem:[%s6142_s7 + $0x70] sm:$0xff]  }
  0x76   : > { %4866 = vmatpush3.bf16.msra.mxu1 %v5460_v16  ;;  %4845 = vmatprep.subr.bf16.mxu0 %v5461_v17  ;;  %v5481_v54 = vld [vmem:[%s6142_s7 + $0x30] sm:$0xff]   ;;  %v5483_v56 = vld [vmem:[%s6142_s7 + $0x68] sm:$0xff]   ;;  %v5486_v59 = vld [vmem:[%s6142_s7 + $0x60] sm:$0xff]  }
  0x77   : > { %4867 = vmatprep.subr.bf16.mxu1 %v5462_v18  ;;  %1596 = vmatprep.mubr.bf16.mxu0 %v1305_v36  ;;  %v5482_v55 = vld [vmem:[%s6142_s7 + $0xb0] sm:$0xff]   ;;  %v5484_v57 = vld [vmem:[%s6142_s7 + $0x28] sm:$0xff]   ;;  %v5487_v60 = vld [vmem:[%s6142_s7 + $0x20] sm:$0xff]   ;;  %s1229_s25 = scalar_lea.vmem %s6865_s24, %s6883_s28  ;;  %s6386_s24 = scalar_lea.vmem %s6805_s14, %s6128_s0 }
  0x78   : > { %1682 = vperm.xlu1 %5444, %v1293_v47   ;;  %v5485_v58 = vld [vmem:[%s6142_s7 + $0xa8] sm:$0xff]   ;;  %v5488_v61 = vld [vmem:[%s6142_s7 + $0xa0] sm:$0xff]   ;;  %v5489_v62 = vld [vmem:[%s6142_s7 + $0x58] sm:$0xff]  }
  0x79   : > { %4846 = vmatpush3.bf16.msra.mxu0 %v5463_v19  ;;  %1670 = vperm.xlu0 %5443, %v1292_v48   ;;  %v5490_v63 = vld [vmem:[%s6142_s7 + $0x18] sm:$0xff]   ;;  %v5492_v1 = vld [vmem:[%s6142_s7 + $0x50] sm:$0xff]   ;;  %v5495_v4 = vld [vmem:[%s6142_s7 + $0x48] sm:$0xff]  }
  0x7a   : > { %4868 = vmatpush3.bf16.msra.mxu1 %v5464_v20  ;;  %4847 = vmatprep.subr.bf16.mxu0 %v5465_v21  ;;  %v5491_v0 = vld [vmem:[%s6142_s7 + $0x98] sm:$0xff]   ;;  %v5493_v2 = vld [vmem:[%s6142_s7 + $0x10] sm:$0xff]   ;;  %v5496_v5 = vld [vmem:[%s6142_s7 + $0x8] sm:$0xff]  }
  0x7b   : > { %4869 = vmatprep.subr.bf16.mxu1 %v5466_v22  ;;  %v5494_v3 = vld [vmem:[%s6142_s7 + $0x90] sm:$0xff]   ;;  %v5497_v6 = vld [vmem:[%s6142_s7 + $0x88] sm:$0xff]   ;;  %v5498_v7 = vld [vmem:[%s6142_s7 + $0x40] sm:$0xff]  }
  0x7c   : > { %1687 = vperm.xlu1 %5444, %v1294_v49   ;;  %v5499_v8 = vld [vmem:[%s6142_s7] sm:$0xff]   ;;  %v5501_v49 = vld [vmem:[%s6176_s27 + $0x38] sm:$0xff]  }
  0x7d   : > { %4848 = vmatpush3.bf16.msra.mxu0 %v5467_v23  ;;  %v5500_v9 = vld [vmem:[%s6142_s7 + $0x80] sm:$0xff]   ;;  %v1658_v23 = vlaneseq }
  0x7e   : > { %4870 = vmatpush3.bf16.msra.mxu1 %v5468_v24  ;;  %4849 = vmatprep.subr.bf16.mxu0 %v5469_v25  ;;  %v4636_v17 = vld [vmem:[%s1205_s10] ss:$0 sm:$0xff] }
  0x7f   : > { %4871 = vmatprep.subr.bf16.mxu1 %v5470_v26 }
  0x81   : > { %4850 = vmatpush3.bf16.msra.mxu0 %v5471_v27 }
  0x82   : > { %4872 = vmatpush3.bf16.msra.mxu1 %v5472_v28  ;;  %4851 = vmatprep.subr.bf16.mxu0 %v5473_v29  ;;  %v6210_v29 = vshrl.u32 %v1658_v23, 7 }
  0x83   : > { %4873 = vmatprep.subr.bf16.mxu1 %v5474_v30 }
  0x84   : > { %vm1660_vm1 = vcmp.lt.s32.totalorder %v6210_v29, 1  ;;  %vm1677_vm2 = vcmp.lt.s32.totalorder %v6210_v29, 7 }
  0x85   : > { %4852 = vmatpush3.bf16.msra.mxu0 %v5475_v31 }
  0x86   : > { %4874 = vmatpush3.bf16.msra.mxu1 %v5476_v32  ;;  %4881 = vmatprep.subr.bf16.mxu0 %v5477_v50 }
  0x87   : > { %5156 = vmatprep.subr.bf16.mxu1 %v5803_v45 }
  0x88   : > { %1597 = vmatmul.mubr.bf16.vlgmr.msra.gmra.mxu0 %v1304_v41 }
  0x89   : > { %1638 = vmatmul.mubr.bf16.vlgmr.msra.gmra.mxu1 %v1306_v46  ;;  %4882 = vmatpush3.bf16.msra.mxu0 %v5478_v51 }
  0x8a   : > { %5157 = vmatpush3.bf16.msra.mxu1 %v5479_v52  ;;  %4883 = vmatprep.subr.bf16.mxu0 %v5480_v53  ;;  %v5502_v52 = vld [vmem:[%s6176_s27 + $0x30] sm:$0xff]   ;;  %v5503_v53 = vld [vmem:[%s6176_s27 + $0x28] sm:$0xff]  }
  0x8b   : > { %5158 = vmatprep.subr.bf16.mxu1 %v5803_v45  ;;  %5172 = vmatprep.mubr.msk.bf16.mxu1 %vm5804_vm0, %v5803_v45 }
  0x8d   : > { %4884 = vmatpush3.bf16.msra.mxu0 %v5481_v54  ;;  %v5504_v54 = vld [vmem:[%s6176_s27 + $0x20] sm:$0xff]  }
  0x8e   : > { %5159 = vmatpush3.bf16.msra.mxu1 %v5482_v55  ;;  %4885 = vmatprep.subr.bf16.mxu0 %v5483_v56  ;;  %v5505_v55 = vld [vmem:[%s6176_s27 + $0x18] sm:$0xff]   ;;  %v5506_v56 = vld [vmem:[%s6176_s27 + $0x10] sm:$0xff]  }
  0x8f   : > { %5160 = vmatprep.subr.bf16.mxu1 %v5803_v45 }
  0x91   : > { %4886 = vmatpush3.bf16.msra.mxu0 %v5484_v57  ;;  %v5507_v57 = vld [vmem:[%s6176_s27 + $0x8] sm:$0xff]  }
  0x92   : > { %5161 = vmatpush3.bf16.msra.mxu1 %v5485_v58  ;;  %4887 = vmatprep.subr.bf16.mxu0 %v5486_v59  ;;  %v5508_v58 = vld [vmem:[%s6176_s27] sm:$0xff]   ;;  %v5509_v59 = vld [vmem:[%s6257_s29 + $0x78] sm:$0xff]   ;;  %s6359_s27 = scalar_lea.vmem %s6803_s12, %s4834_s5 }
  0x93   : > { %5162 = vmatprep.subr.bf16.mxu1 %v5803_v45 }
  0x95   : > { %4888 = vmatpush3.bf16.msra.mxu0 %v5487_v60  ;;  %v5510_v60 = vld [vmem:[%s6257_s29 + $0x38] sm:$0xff]  }
  0x96   : > { %5163 = vmatpush3.bf16.msra.mxu1 %v5488_v61  ;;  %4889 = vmatprep.subr.bf16.mxu0 %v5489_v62  ;;  %v5512_v61 = vld [vmem:[%s6257_s29 + $0x70] sm:$0xff]  }
  0x97   : > { %5164 = vmatprep.subr.bf16.mxu1 %v5803_v45  ;;  %v5513_v62 = vld [vmem:[%s6257_s29 + $0x30] sm:$0xff]  }
  0x99   : > { %4890 = vmatpush3.bf16.msra.mxu0 %v5490_v63  ;;  %v5515_v63 = vld [vmem:[%s6257_s29 + $0x68] sm:$0xff]  }
  0x9a   : > { %5165 = vmatpush3.bf16.msra.mxu1 %v5491_v0  ;;  %4891 = vmatprep.subr.bf16.mxu0 %v5492_v1  ;;  %v5516_v0 = vld [vmem:[%s6257_s29 + $0x28] sm:$0xff]   ;;  %v5518_v1 = vld [vmem:[%s6257_s29 + $0x60] sm:$0xff]  }
  0x9b   : > { %5166 = vmatprep.subr.bf16.mxu1 %v5803_v45 }
  0x9d   : > { %4892 = vmatpush3.bf16.msra.mxu0 %v5493_v2  ;;  %v5519_v2 = vld [vmem:[%s6257_s29 + $0x20] sm:$0xff]  }
  0x9e   : > { %5167 = vmatpush3.bf16.msra.mxu1 %v5494_v3  ;;  %4893 = vmatprep.subr.bf16.mxu0 %v5495_v4 }
  0x9f   : > { %5168 = vmatprep.subr.bf16.mxu1 %v5803_v45 }
  0xa1   : > { %4894 = vmatpush3.bf16.msra.mxu0 %v5496_v5 }
  0xa2   : > { %5169 = vmatpush3.bf16.msra.mxu1 %v5497_v6  ;;  %4895 = vmatprep.subr.bf16.mxu0 %v5498_v7 }
  0xa3   : > { %5170 = vmatprep.subr.bf16.mxu1 %v5803_v45 }
  0xa5   : > { %4896 = vmatpush3.bf16.msra.mxu0 %v5499_v8 }
  0xa6   : > { %5171 = vmatpush3.bf16.msra.mxu1 %v5500_v9  ;;  %5176 = vmatprep.subr.bf16.mxu0 %v5803_v45 }
  0xa7   : > { %4921 = vmatprep.subr.bf16.mxu1 %v5509_v59 }
  0xf0   : > { %v6214_v31 = vpop.permute.xlu0 %1665 }
  0xf3   : > { %v6206_v27 = vpop.permute.xlu1 %1682 }
  0xf4   : > { %v6221_v39 = vpop.permute.xlu0 %1670 }
  0xf7   : > { %v6219_v38 = vpop.permute.xlu1 %1687 }
 0x148   : > { %v4853_v10 = vpop.f32.mrf.mxu0 }
 0x149   : > { %v4875_v11 = vpop.f32.mrf.mxu1 }
 0x14a   : > { %v4854_v12 = vpop.f32.mrf.mxu0 }
 0x14b   : > { %v4855_v13 = vadd.f32 %v4854_v12, %v4853_v10  ;;  %v4876_v14 = vpop.f32.mrf.mxu1 }
 0x14c   : > { %v4877_v15 = vadd.f32 %v4876_v14, %v4875_v11  ;;  %v4856_v16 = vpop.f32.mrf.mxu0  ;;  %v4661_v11 = vld [vmem:[%s1213_s19] ss:$0 sm:$0xff]  ;;  %s4586_s19 = sshll.u32 %s6061_s18, 7 }
 0x14d   : > { %v4878_v18 = vpop.f32.mrf.mxu1 }
 0x14e   : > { %v1640_v19 = vadd.f32 %v4877_v15, %v4855_v13  ;;  %v4857_v20 = vpop.f32.mrf.mxu0 }
 0x14f   : > { %v4858_v21 = vadd.f32 %v4857_v20, %v4856_v16  ;;  %v4879_v22 = vpop.f32.mrf.mxu1  ;;  %v5511_v20 = vld [vmem:[%s6257_s29 + $0xb8] sm:$0xff]  }
 0x150   : > { %v6204_v24 = vadd.f32 %v4636_v17, %v1640_v19  ;;  %v4880_v25 = vadd.f32 %v4879_v22, %v4878_v18  ;;  %v5514_v22 = vld [vmem:[%s6257_s29 + $0xb0] sm:$0xff]  }
 0x152   : > { %v1643_v26 = vadd.f32 %v4880_v25, %v4858_v21  ;;  %v1654_v28 = vmax.f32 %v6204_v24, 0.0  ;;  %v5517_v25 = vld [vmem:[%s6257_s29 + $0xa8] sm:$0xff]  }
 0x154   : > { %v6212_v30 = vadd.f32 %v4636_v17, %v1643_v26  ;;  %v1656_v33 = vrot.slane %v1654_v28, 7  ;;  %v1675_v34 = vrot.slane %v1654_v28, 1  ;;  %v5520_v26 = vld [vmem:[%s6257_s29 + $0xa0] sm:$0xff]  }
 0x156   : > { %v1655_v32 = vmax.f32 %v6212_v30, 0.0 }
 0x158   : > { %v1657_v35 = vrot.slane %v1655_v32, 7  ;;  %v1676_v36 = vrot.slane %v1655_v32, 1  ;;  %v1694_v37 = vpack.c.bf16 %v1655_v32, %v1654_v28  ;;  %v5521_v28 = vld [vmem:[%s6257_s29 + $0x58] sm:$0xff]  }
 0x159   : > { %v5522_v32 = vld [vmem:[%s6257_s29 + $0x18] sm:$0xff]  }
 0x15a   : > { %1920 = vmatprep.mubr.bf16.mxu0 %v1694_v37  ;;  %v1661_v40 = vsel %vm1660_vm1, %v1656_v33, %v1657_v35  ;;  %v1662_v41 = vsel %vm1660_vm1, %v1657_v35, %v1656_v33  ;;  %v1678_v42 = vsel %vm1677_vm2, %v1675_v34, %v1676_v36  ;;  %v1679_v43 = vsel %vm1677_vm2, %v1676_v36, %v1675_v34  ;;  %v5523_v33 = vld [vmem:[%s6257_s29 + $0x98] sm:$0xff]   ;;  %v5524_v34 = vld [vmem:[%s6257_s29 + $0x50] sm:$0xff]   ;;  %v5527_v37 = vld [vmem:[%s6257_s29 + $0x48] sm:$0xff]  }
 0x15b   : > { %v1673_v44 = vmul.f32 %v6214_v31, %v1662_v41  ;;  %v1674_v46 = vmul.f32 %v6221_v39, %v1661_v40  ;;  %v1690_v47 = vmul.f32 %v6206_v27, %v1678_v42  ;;  %v1691_v48 = vmul.f32 %v6219_v38, %v1679_v43  ;;  %v5525_v35 = vld [vmem:[%s6257_s29 + $0x10] sm:$0xff]   ;;  %v5528_v40 = vld [vmem:[%s6257_s29 + $0x8] sm:$0xff]   ;;  %v5530_v42 = vld [vmem:[%s6257_s29 + $0x40] sm:$0xff]  }
 0x15c   : > { %v5526_v36 = vld [vmem:[%s6257_s29 + $0x90] sm:$0xff]   ;;  %v5529_v41 = vld [vmem:[%s6257_s29 + $0x88] sm:$0xff]   ;;  %v5531_v43 = vld [vmem:[%s6257_s29] sm:$0xff]  }
 0x15d   : > { %v1693_v50 = vpack.c.bf16 %v1674_v46, %v1673_v44  ;;  %v1695_v51 = vpack.c.bf16 %v1691_v48, %v1690_v47  ;;  %v5532_v44 = vld [vmem:[%s6257_s29 + $0x80] sm:$0xff]   ;;  %s6429_s29 = scalar_lea.vmem %s6807_s16, %s6128_s0 }
 0x15e   : > { %v4670_v46 = vld [vmem:[%s1221_s6] ss:$0 sm:$0xff]  ;;  %s6367_s6 = scalar_lea.vmem %s6811_s20, %s4834_s5 }
 0x15f   : > { %1921 = vmatmul.mubr.bf16.vlgmr.msra.gmra.mxu0 %v1693_v50  ;;  %5173 = vmatmul.mubr.bf16.vlgmr.msra.gmra.mxu1 %v1695_v51 }
 0x160   : > { %5177 = vmatpush3.bf16.msra.mxu0 %v5501_v49  ;;  %5192 = vmatprep.mubr.msk.bf16.mxu0 %vm5804_vm0, %v5803_v45 }
 0x161   : > { %5178 = vmatprep.subr.bf16.mxu0 %v5803_v45  ;;  %4922 = vmatpush3.bf16.msra.mxu1 %v5510_v60 }
 0x162   : > { %4923 = vmatprep.subr.bf16.mxu1 %v5512_v61 }
 0x164   : > { %5179 = vmatpush3.bf16.msra.mxu0 %v5502_v52 }
 0x165   : > { %5180 = vmatprep.subr.bf16.mxu0 %v5803_v45  ;;  %4924 = vmatpush3.bf16.msra.mxu1 %v5513_v62 }
 0x166   : > { %4925 = vmatprep.subr.bf16.mxu1 %v5515_v63 }
 0x168   : > { %5181 = vmatpush3.bf16.msra.mxu0 %v5503_v53 }
 0x169   : > { %5182 = vmatprep.subr.bf16.mxu0 %v5803_v45  ;;  %4926 = vmatpush3.bf16.msra.mxu1 %v5516_v0 }
 0x16a   : > { %4927 = vmatprep.subr.bf16.mxu1 %v5518_v1 }
 0x16c   : > { %5183 = vmatpush3.bf16.msra.mxu0 %v5504_v54 }
 0x16d   : > { %5184 = vmatprep.subr.bf16.mxu0 %v5803_v45  ;;  %4928 = vmatpush3.bf16.msra.mxu1 %v5519_v2  ;;  %v5533_v2 = vld [vmem:[%s6065_s23 + $0x38] sm:$0xff]  }
 0x16e   : > { %4929 = vmatprep.subr.bf16.mxu1 %v5521_v28 }
 0x170   : > { %5185 = vmatpush3.bf16.msra.mxu0 %v5505_v55 }
 0x171   : > { %5186 = vmatprep.subr.bf16.mxu0 %v5803_v45  ;;  %4930 = vmatpush3.bf16.msra.mxu1 %v5522_v32 }
 0x172   : > { %4931 = vmatprep.subr.bf16.mxu1 %v5524_v34 }
 0x174   : > { %5187 = vmatpush3.bf16.msra.mxu0 %v5506_v56 }
 0x175   : > { %5188 = vmatprep.subr.bf16.mxu0 %v5803_v45  ;;  %4932 = vmatpush3.bf16.msra.mxu1 %v5525_v35 }
 0x176   : > { %4933 = vmatprep.subr.bf16.mxu1 %v5527_v37 }
 0x178   : > { %5189 = vmatpush3.bf16.msra.mxu0 %v5507_v57 }
 0x179   : > { %5190 = vmatprep.subr.bf16.mxu0 %v5803_v45  ;;  %4934 = vmatpush3.bf16.msra.mxu1 %v5528_v40 }
 0x17a   : > { %4935 = vmatprep.subr.bf16.mxu1 %v5530_v42  ;;  %v4704_v42 = vld [vmem:[%s1237_s26] ss:$0 sm:$0xff] }
 0x17c   : > { %5191 = vmatpush3.bf16.msra.mxu0 %v5508_v58 }
 0x17d   : > { %5196 = vmatprep.subr.bf16.mxu0 %v5803_v45  ;;  %4936 = vmatpush3.bf16.msra.mxu1 %v5531_v43 }
 0x17e   : > { %5216 = vmatprep.subr.bf16.mxu1 %v5803_v45 }
 0x21f   : > { %v4897_v3 = vpop.f32.mrf.mxu0  ;;  %v1963_v4 = vpop.f32.mrf.mxu1 }
 0x221   : > { %v4898_v5 = vpop.f32.mrf.mxu0  ;;  %v5174_v6 = vpop.f32.mrf.mxu1 }
 0x222   : > { %v4899_v7 = vadd.f32 %v4898_v5, %v4897_v3  ;;  %v5534_v5 = vld [vmem:[%s6065_s23 + $0x30] sm:$0xff]   ;;  %v5535_v6 = vld [vmem:[%s6065_s23 + $0x28] sm:$0xff]  }
 0x223   : > { %v4900_v8 = vpop.f32.mrf.mxu0  ;;  %v1966_v9 = vpop.f32.mrf.mxu1 }
 0x224   : > { %v1964_v10 = vadd.f32 %v4899_v7, %v1963_v4  ;;  %v5536_v7 = vld [vmem:[%s6065_s23 + $0x20] sm:$0xff]  }
 0x225   : > { %v4901_v12 = vpop.f32.mrf.mxu0  ;;  %v5175_v13 = vpop.f32.mrf.mxu1 }
 0x226   : > { %v4902_v14 = vadd.f32 %v4901_v12, %v4900_v8  ;;  %v1976_v15 = vadd.f32 %v4661_v11, %v1964_v10  ;;  %v5537_v8 = vld [vmem:[%s6065_s23 + $0x18] sm:$0xff]   ;;  %v5539_v10 = vld [vmem:[%s6065_s23 + $0x8] sm:$0xff]  }
 0x228   : > { %v1967_v16 = vadd.f32 %v4902_v14, %v1966_v9  ;;  %v1978_v18 = vmax.f32 %v1976_v15, 0.0  ;;  %v5538_v9 = vld [vmem:[%s6065_s23 + $0x10] sm:$0xff]  }
 0x22a   : > { %v1977_v17 = vadd.f32 %v4661_v11, %v1967_v16  ;;  %v5540_v11 = vld [vmem:[%s6065_s23] sm:$0xff]  }
 0x22c   : > { %v1979_v19 = vmax.f32 %v1977_v17, 0.0  ;;  %v4695_v17 = vld [vmem:[%s1229_s25] ss:$0 sm:$0xff] }
 0x22e   : > { %v1981_v21 = vpack.c.bf16 %v1979_v19, %v1978_v18 }
 0x230   : > { %5193 = vmatmul.mubr.bf16.vlgmr.msra.gmra.mxu0 %v1981_v21 }
 0x231   : > { %5197 = vmatpush3.bf16.msra.mxu0 %v5511_v20  ;;  %5212 = vmatprep.mubr.msk.bf16.mxu0 %vm5804_vm0, %v5803_v45 }
 0x232   : > { %5198 = vmatprep.subr.bf16.mxu0 %v5803_v45 }
 0x235   : > { %5199 = vmatpush3.bf16.msra.mxu0 %v5514_v22 }
 0x236   : > { %5200 = vmatprep.subr.bf16.mxu0 %v5803_v45 }
 0x239   : > { %5201 = vmatpush3.bf16.msra.mxu0 %v5517_v25 }
 0x23a   : > { %5202 = vmatprep.subr.bf16.mxu0 %v5803_v45 }
 0x23d   : > { %5203 = vmatpush3.bf16.msra.mxu0 %v5520_v26 }
 0x23e   : > { %5204 = vmatprep.subr.bf16.mxu0 %v5803_v45 }
 0x241   : > { %5205 = vmatpush3.bf16.msra.mxu0 %v5523_v33 }
 0x242   : > { %5206 = vmatprep.subr.bf16.mxu0 %v5803_v45 }
 0x245   : > { %5207 = vmatpush3.bf16.msra.mxu0 %v5526_v36 }
 0x246   : > { %5208 = vmatprep.subr.bf16.mxu0 %v5803_v45 }
 0x249   : > { %5209 = vmatpush3.bf16.msra.mxu0 %v5529_v41 }
 0x24a   : > { %5210 = vmatprep.subr.bf16.mxu0 %v5803_v45 }
 0x24d   : > { %5211 = vmatpush3.bf16.msra.mxu0 %v5532_v44 }
 0x2f0   : > { %v2080_v47 = vpop.f32.mrf.mxu0 }
 0x2f1   : > { %v2093_v48 = vadd.f32 %v4670_v46, %v2080_v47 }
 0x2f2   : > { %v5194_v49 = vpop.f32.mrf.mxu0 }
 0x2f3   : > { %v2095_v50 = vadd.f32 %v2093_v48, %v6204_v24 }
 0x2f4   : > { %v2083_v51 = vpop.f32.mrf.mxu0 }
 0x2f5   : > { %v2094_v52 = vadd.f32 %v4670_v46, %v2083_v51  ;;  %v2097_v55 = vrot.slane %v2095_v50, 7  ;;  %v2103_v56 = vrot.slane %v2095_v50, 1 }
 0x2f6   : > { %v5195_v53 = vpop.f32.mrf.mxu0 }
 0x2f7   : > { %v2096_v54 = vadd.f32 %v2094_v52, %v6212_v30  ;;  %v6351_v52 = vand.u32 127, %v1658_v23  ;;  %v2579_v23 = vld [vmem:[%s6359_s27 + $0x78] sm:$0xff] }
 0x2f8   : > { %5236 = vmatprep.subr.mxu0 %v2579_v23 }
 0x2f9   : > { %v2098_v57 = vrot.slane %v2096_v54, 7  ;;  %v2104_v58 = vrot.slane %v2096_v54, 1  ;;  %v2111_v59 = vpack.c.bf16 %v2096_v54, %v2095_v50  ;;  %vm4169_vm9 = vcmp.eq.s32.totalorder %v6351_v52, 0 }
 0x2fa   : > { %vm4171_vm10 = vcmp.eq.s32.totalorder %v6351_v52, 1 }
 0x2fb   : > { %2337 = vmatprep.mubr.bf16.mxu1 %v2111_v59  ;;  %v2099_v60 = vsel %vm1660_vm1, %v2097_v55, %v2098_v57  ;;  %v2100_v61 = vsel %vm1660_vm1, %v2098_v57, %v2097_v55  ;;  %v2105_v24 = vsel %vm1677_vm2, %v2103_v56, %v2104_v58  ;;  %v2106_v30 = vsel %vm1677_vm2, %v2104_v58, %v2103_v56 }
 0x2fc   : > { %v2101_v62 = vmul.f32 %v2100_v61, %v6214_v31  ;;  %v2102_v63 = vmul.f32 %v2099_v60, %v6221_v39  ;;  %v2107_v0 = vmul.f32 %v2105_v24, %v6206_v27  ;;  %v2108_v1 = vmul.f32 %v2106_v30, %v6219_v38  ;;  %v2578_v61 = vld [vmem:[%s6359_s27 + $0x70] sm:$0xff]  ;;  %v2577_v24 = vld [vmem:[%s6359_s27 + $0x68] sm:$0xff]  ;;  %v2576_v30 = vld [vmem:[%s6359_s27 + $0x60] sm:$0xff] }
 0x2fe   : > { %v2110_v3 = vpack.c.bf16 %v2102_v63, %v2101_v62  ;;  %v2112_v4 = vpack.c.bf16 %v2108_v1, %v2107_v0  ;;  %v2575_v62 = vld [vmem:[%s6359_s27 + $0x58] sm:$0xff]  ;;  %v2574_v63 = vld [vmem:[%s6359_s27 + $0x50] sm:$0xff]  ;;  %v2573_v0 = vld [vmem:[%s6359_s27 + $0x48] sm:$0xff] }
 0x2ff   : > { %v2572_v1 = vld [vmem:[%s6359_s27 + $0x40] sm:$0xff] }
 0x300   : > { %2338 = vmatmul.mubr.bf16.vlgmr.msra.gmra.mxu1 %v2110_v3  ;;  %5213 = vmatmul.mubr.bf16.vlgmr.msra.gmra.mxu0 %v2112_v4  ;;  %v2570_v3 = vld [vmem:[%s6359_s27 + $0x30] sm:$0xff]  ;;  %v2569_v4 = vld [vmem:[%s6359_s27 + $0x28] sm:$0xff] }
 0x301   : > { %5217 = vmatpush3.bf16.msra.mxu1 %v5533_v2  ;;  %5232 = vmatprep.mubr.msk.bf16.mxu1 %vm5804_vm0, %v5803_v45  ;;  %v2571_v2 = vld [vmem:[%s6359_s27 + $0x38] sm:$0xff] }
 0x302   : > { %5218 = vmatprep.subr.bf16.mxu1 %v5803_v45  ;;  %5237 = vmatpush3.msra.mxu0 %v2579_v23  ;;  %v5561_v23 = vld [vmem:[%s6386_s24 + $0x88] sm:$0xff]  }
 0x303   : > { %5238 = vmatprep.subr.mxu0 %v2578_v61 }
 0x304   : > { %5239 = vmatpush3.msra.mxu0 %v2578_v61  ;;  %v5562_v61 = vld [vmem:[%s6386_s24 + $0x40] sm:$0xff]  }
 0x305   : > { %5219 = vmatpush3.bf16.msra.mxu1 %v5534_v5  ;;  %5240 = vmatprep.subr.mxu0 %v2577_v24  ;;  %v2568_v5 = vld [vmem:[%s6359_s27 + $0x20] sm:$0xff] }
 0x306   : > { %5220 = vmatprep.subr.bf16.mxu1 %v5803_v45  ;;  %5241 = vmatpush3.msra.mxu0 %v2577_v24  ;;  %v5563_v24 = vld [vmem:[%s6386_s24] sm:$0xff]  }
 0x307   : > { %5242 = vmatprep.subr.mxu0 %v2576_v30 }
 0x308   : > { %5243 = vmatpush3.msra.mxu0 %v2576_v30  ;;  %v5564_v30 = vld [vmem:[%s6386_s24 + $0x80] sm:$0xff]  }
 0x309   : > { %5221 = vmatpush3.bf16.msra.mxu1 %v5535_v6  ;;  %5244 = vmatprep.subr.mxu0 %v2575_v62 }
 0x30a   : > { %5222 = vmatprep.subr.bf16.mxu1 %v5803_v45  ;;  %5245 = vmatpush3.msra.mxu0 %v2575_v62  ;;  %v5565_v62 = vld [vmem:[%s6429_s29 + $0x78] sm:$0xff]  }
 0x30b   : > { %5246 = vmatprep.subr.mxu0 %v2574_v63 }
 0x30c   : > { %5247 = vmatpush3.msra.mxu0 %v2574_v63 }
 0x30d   : > { %5223 = vmatpush3.bf16.msra.mxu1 %v5536_v7  ;;  %5248 = vmatprep.subr.mxu0 %v2573_v0 }
 0x30e   : > { %5224 = vmatprep.subr.bf16.mxu1 %v5803_v45  ;;  %5249 = vmatpush3.msra.mxu0 %v2573_v0 }
 0x30f   : > { %5250 = vmatprep.subr.mxu0 %v2572_v1 }
 0x310   : > { %5251 = vmatpush3.msra.mxu0 %v2572_v1 }
 0x311   : > { %5225 = vmatpush3.bf16.msra.mxu1 %v5537_v8  ;;  %5252 = vmatprep.subr.mxu0 %v2571_v2 }
 0x312   : > { %5226 = vmatprep.subr.bf16.mxu1 %v5803_v45  ;;  %5253 = vmatpush3.msra.mxu0 %v2571_v2 }
 0x313   : > { %5254 = vmatprep.subr.mxu0 %v2570_v3 }
 0x314   : > { %5255 = vmatpush3.msra.mxu0 %v2570_v3 }
 0x315   : > { %5227 = vmatpush3.bf16.msra.mxu1 %v5538_v9  ;;  %5256 = vmatprep.subr.mxu0 %v2569_v4 }
 0x316   : > { %5228 = vmatprep.subr.bf16.mxu1 %v5803_v45  ;;  %5257 = vmatpush3.msra.mxu0 %v2569_v4 }
 0x317   : > { %5258 = vmatprep.subr.mxu0 %v2568_v5 }
 0x318   : > { %5259 = vmatpush3.msra.mxu0 %v2568_v5 }
 0x319   : > { %5229 = vmatpush3.bf16.msra.mxu1 %v5539_v10 }
 0x31a   : > { %5230 = vmatprep.subr.bf16.mxu1 %v5803_v45 }
 0x31d   : > { %5231 = vmatpush3.bf16.msra.mxu1 %v5540_v11 }
 0x3c0   : > { %v4937_v12 = vpop.f32.mrf.mxu1  ;;  %v2380_v13 = vpop.f32.mrf.mxu0 }
 0x3c2   : > { %v4938_v14 = vpop.f32.mrf.mxu1  ;;  %v5214_v15 = vpop.f32.mrf.mxu0 }
 0x3c3   : > { %v4939_v16 = vadd.f32 %v4938_v14, %v4937_v12  ;;  %v2567_v14 = vld [vmem:[%s6359_s27 + $0x18] sm:$0xff]  ;;  %v2566_v15 = vld [vmem:[%s6359_s27 + $0x10] sm:$0xff] }
 0x3c4   : > { %v4940_v18 = vpop.f32.mrf.mxu1  ;;  %v2383_v19 = vpop.f32.mrf.mxu0  ;;  %5260 = vmatprep.subr.mxu0 %v2567_v14 }
 0x3c5   : > { %v2381_v20 = vadd.f32 %v4939_v16, %v2380_v13  ;;  %5261 = vmatpush3.msra.mxu0 %v2567_v14  ;;  %v2565_v16 = vld [vmem:[%s6359_s27 + $0x8] sm:$0xff]  ;;  %v5566_v14 = vld [vmem:[%s6429_s29 + $0x38] sm:$0xff]  }
 0x3c6   : > { %v4941_v21 = vpop.f32.mrf.mxu1  ;;  %v5215_v22 = vpop.f32.mrf.mxu0  ;;  %5262 = vmatprep.subr.mxu0 %v2566_v15 }
 0x3c7   : > { %v6336_v25 = vadd.f32 %v4695_v17, %v2381_v20  ;;  %v4942_v26 = vadd.f32 %v4941_v21, %v4940_v18  ;;  %5263 = vmatpush3.msra.mxu0 %v2566_v15  ;;  %v5541_v18 = vld [vmem:[%s6386_s24 + $0x78] sm:$0xff]   ;;  %v5544_v20 = vld [vmem:[%s6386_s24 + $0x70] sm:$0xff]   ;;  %v5547_v22 = vld [vmem:[%s6386_s24 + $0x68] sm:$0xff]  }
 0x3c8   : > { %5264 = vmatprep.subr.mxu0 %v2565_v16  ;;  %4979 = vmatprep.subr.bf16.mxu1 %v5541_v18  ;;  %v5545_v21 = vld [vmem:[%s6386_s24 + $0x30] sm:$0xff]   ;;  %v5567_v15 = vld [vmem:[%s6429_s29 + $0xb8] sm:$0xff]  }
 0x3c9   : > { %v2384_v28 = vadd.f32 %v4942_v26, %v2383_v19  ;;  %v2395_v32 = vmul.f32 %v6336_v25, %v6336_v25  ;;  %5265 = vmatpush3.msra.mxu0 %v2565_v16  ;;  %v5542_v19 = vld [vmem:[%s6386_s24 + $0x38] sm:$0xff]   ;;  %v5548_v26 = vld [vmem:[%s6386_s24 + $0x28] sm:$0xff]   ;;  %v5568_v18 = vld [vmem:[%s6429_s29 + $0x70] sm:$0xff]  }
 0x3cb   : > { %v6340_v33 = vadd.f32 %v4695_v17, %v2384_v28  ;;  %2397 = vadd.xlane.f32.xlu0 %v2395_v32  ;;  %v2564_v17 = vld [vmem:[%s6359_s27] sm:$0xff]  ;;  %s6530_s27 = scalar_lea.vmem [#allocation6], %s4586_s19 }
 0x3cc   : > { %5266 = vmatprep.subr.mxu0 %v2564_v17  ;;  %v5550_v28 = vld [vmem:[%s6386_s24 + $0x60] sm:$0xff]  }
 0x3cd   : > { %v2401_v34 = vpack.c.bf16 %v6340_v33, %v6336_v25  ;;  %v2396_v35 = vmul.f32 %v6340_v33, %v6340_v33  ;;  %5267 = vmatpush3.msra.mxu0 %v2564_v17  ;;  %v5551_v32 = vld [vmem:[%s6386_s24 + $0x20] sm:$0xff]  }
 0x3ce   : > { %5271 = vmatprep.subr.bf16.mxu0 %v5803_v45 }
 0x3cf   : > { %5233 = vmatmul.mubr.bf16.vlgmr.msra.gmra.mxu1 %v2401_v34  ;;  %2399 = vadd.xlane.f32.xlu1 %v2396_v35  ;;  %v5553_v34 = vld [vmem:[%s6386_s24 + $0x58] sm:$0xff]  }
 0x3d0   : > { %4980 = vmatpush3.bf16.msra.mxu1 %v5542_v19  ;;  %v5554_v35 = vld [vmem:[%s6386_s24 + $0x18] sm:$0xff]   ;;  %v5569_v19 = vld [vmem:[%s6429_s29 + $0x30] sm:$0xff]  }
 0x3d1   : > { %4981 = vmatprep.subr.bf16.mxu1 %v5544_v20  ;;  %v5570_v20 = vld [vmem:[%s6429_s29 + $0xb0] sm:$0xff]  }
 0x3d4   : > { %4982 = vmatpush3.bf16.msra.mxu1 %v5545_v21  ;;  %v5571_v21 = vld [vmem:[%s6429_s29 + $0x68] sm:$0xff]  }
 0x3d5   : > { %4983 = vmatprep.subr.bf16.mxu1 %v5547_v22  ;;  %v5572_v22 = vld [vmem:[%s6429_s29 + $0x28] sm:$0xff]  }
 0x3d8   : > { %4984 = vmatpush3.bf16.msra.mxu1 %v5548_v26  ;;  %v5573_v26 = vld [vmem:[%s6429_s29 + $0xa8] sm:$0xff]  }
 0x3d9   : > { %4985 = vmatprep.subr.bf16.mxu1 %v5550_v28  ;;  %v5574_v28 = vld [vmem:[%s6429_s29 + $0x60] sm:$0xff]  }
 0x3dc   : > { %4986 = vmatpush3.bf16.msra.mxu1 %v5551_v32  ;;  %v5575_v32 = vld [vmem:[%s6429_s29 + $0x20] sm:$0xff]  }
 0x3dd   : > { %4987 = vmatprep.subr.bf16.mxu1 %v5553_v34  ;;  %v5576_v34 = vld [vmem:[%s6429_s29 + $0xa0] sm:$0xff]  }
 0x3e0   : > { %4988 = vmatpush3.bf16.msra.mxu1 %v5554_v35  ;;  %v5577_v35 = vld [vmem:[%s6429_s29 + $0x58] sm:$0xff]  }
 0x454   : > { %v2398_v40 = vpop.xlane.xlu0 %2397 }
 0x458   : > { %v2400_v48 = vpop.xlane.xlu1 %2399 }
 0x48f   : > { %v2500_v36 = vpop.f32.mrf.mxu1 }
 0x490   : > { %v2507_v37 = vmul.f32 2.0, %v2500_v36  ;;  %v5556_v36 = vld [vmem:[%s6386_s24 + $0x50] sm:$0xff]  }
 0x491   : > { %v5234_v41 = vpop.f32.mrf.mxu1  ;;  %4989 = vmatprep.subr.bf16.mxu1 %v5556_v36  ;;  %v5578_v36 = vld [vmem:[%s6429_s29 + $0x18] sm:$0xff]  }
 0x492   : > { %v2509_v43 = vsub.f32 %v2398_v40, %v2507_v37  ;;  %v5557_v37 = vld [vmem:[%s6386_s24 + $0x10] sm:$0xff]  }
 0x493   : > { %v2503_v44 = vpop.f32.mrf.mxu1  ;;  %4990 = vmatpush3.bf16.msra.mxu1 %v5557_v37  ;;  %v5579_v37 = vld [vmem:[%s6429_s29 + $0x98] sm:$0xff]  }
 0x494   : > { %v2508_v46 = vmul.f32 2.0, %v2503_v44  ;;  %v2518_v47 = vadd.f32 %v4704_v42, %v2509_v43 }
 0x495   : > { %v5235_v49 = vpop.f32.mrf.mxu1 }
 0x496   : > { %v2510_v50 = vsub.f32 %v2400_v48, %v2508_v46  ;;  %2520 = vmin.xlane.f32.xlu0 %v2518_v47 }
 0x498   : > { %v2519_v51 = vadd.f32 %v4704_v42, %v2510_v50  ;;  %v5805_v50 = vmov 1.0  }
 0x49a   : > { %2522 = vmin.xlane.f32.xlu0 %v2519_v51 }
 0x51f   : > { %v2521_v53 = vpop.xlane.xlu0 %2520 }
 0x520   : > { %vm2526_vm3 = vcmp.le.f32.partialorder %v2518_v47, %v2521_v53  ;;  %v5543_v53 = vld [vmem:[%s6386_s24 + $0xb8] sm:$0xff]  }
 0x521   : > { %v2528_v54 = vsel %vm2526_vm3, %v6351_v52, 128 }
 0x522   : > { %v2531_v55 = vshra.s32 %v2528_v54, 16  ;;  %v2530_v6 = vand.u32 65535, %v2528_v54  ;;  %v5546_v54 = vld [vmem:[%s6386_s24 + $0xb0] sm:$0xff]  }
 0x523   : > { %v2523_v56 = vpop.xlane.xlu0 %2522 }
 0x524   : > { %vm2527_vm4 = vcmp.le.f32.partialorder %v2519_v51, %v2523_v56  ;;  %v2533_v57 = vcvt.s32.f32 %v2531_v55  ;;  %v2532_v9 = vcvt.s32.f32 %v2530_v6  ;;  %v5549_v55 = vld [vmem:[%s6386_s24 + $0xa8] sm:$0xff]   ;;  %v5552_v56 = vld [vmem:[%s6386_s24 + $0xa0] sm:$0xff]  }
 0x525   : > { %v2529_v58 = vsel %vm2527_vm4, %v6351_v52, 128 }
 0x526   : > { %2534 = vmin.xlane.f32.xlu1 %v2533_v57  ;;  %v2545_v59 = vshra.s32 %v2529_v58, 16  ;;  %v2544_v7 = vand.u32 65535, %v2529_v58  ;;  %v5558_v58 = vld [vmem:[%s6386_s24 + $0x90] sm:$0xff]  }
 0x528   : > { %v2547_v60 = vcvt.s32.f32 %v2545_v59  ;;  %v2546_v12 = vcvt.s32.f32 %v2544_v7  ;;  %v5559_v59 = vld [vmem:[%s6386_s24 + $0x48] sm:$0xff]  }
 0x529   : > { %4991 = vmatprep.subr.bf16.mxu1 %v5559_v59 }
 0x52a   : > { %2548 = vmin.xlane.f32.xlu0 %v2547_v60 }
 0x5af   : > { %v2535_v8 = vpop.xlane.xlu1 %2534 }
 0x5b0   : > { %vm2536_vm5 = vcmp.eq.f32.partialorder %v2533_v57, %v2535_v8  ;;  %v2541_v40 = vcvt.f32.s32 %v2535_v8  ;;  %v5555_v57 = vld [vmem:[%s6386_s24 + $0x98] sm:$0xff]  }
 0x5b1   : > { %v2537_v10 = vsel %vm2536_vm5, %v2532_v9, inf }
 0x5b2   : > { %2538 = vmin.xlane.f32.xlu1 %v2537_v10  ;;  %v2542_v42 = vshll.u32 %v2541_v40, 16  ;;  %v5580_v40 = vld [vmem:[%s6429_s29 + $0x50] sm:$0xff]  }
 0x5b3   : > { %v2549_v11 = vpop.xlane.xlu0 %2548 }
 0x5b4   : > { %vm2550_vm6 = vcmp.eq.f32.partialorder %v2547_v60, %v2549_v11  ;;  %v2555_v43 = vcvt.f32.s32 %v2549_v11  ;;  %v5560_v60 = vld [vmem:[%s6386_s24 + $0x8] sm:$0xff]   ;;  %s6867_s24 = sld [smem:[#allocation28_spill]] }
 0x5b5   : > { %v2551_v13 = vsel %vm2550_vm6, %v2546_v12, inf  ;;  %4992 = vmatpush3.bf16.msra.mxu1 %v5560_v60 }
 0x5b6   : > { %2552 = vmin.xlane.f32.xlu0 %v2551_v13  ;;  %v2556_v48 = vshll.u32 %v2555_v43, 16  ;;  %4993 = vmatprep.subr.bf16.mxu1 %v5562_v61  ;;  %v5583_v43 = vld [vmem:[%s6429_s29 + $0x48] sm:$0xff]  }
 0x5b9   : > { %4994 = vmatpush3.bf16.msra.mxu1 %v5563_v24 }
 0x5ba   : > { %5010 = vmatprep.subr.bf16.mxu1 %v5565_v62  ;;  %s6570_s25 = scalar_lea.vmem %s6867_s24, %s6128_s0  ;;  %s6871_s24 = sld [smem:[#allocation30_spill]] }
 0x63b   : > { %v2539_v41 = vpop.xlane.xlu1 %2538 }
 0x63c   : > { %v2540_v44 = vcvt.f32.s32 %v2539_v41  ;;  %v5581_v41 = vld [vmem:[%s6429_s29 + $0x10] sm:$0xff]  }
 0x63e   : > { %v2543_v46 = vadd.s32 %v2542_v42, %v2540_v44  ;;  %v5582_v42 = vld [vmem:[%s6429_s29 + $0x90] sm:$0xff]   ;;  %v5584_v44 = vld [vmem:[%s6429_s29 + $0x8] sm:$0xff]  }
 0x63f   : > { %v2553_v47 = vpop.xlane.xlu0 %2552 }
 0x640   : > { %v2554_v49 = vcvt.f32.s32 %v2553_v47  ;;  %vm2558_vm7 = vcmp.eq.s32.totalorder %v6351_v52, %v2543_v46  ;;  %v5585_v46 = vld [vmem:[%s6429_s29 + $0x88] sm:$0xff]   ;;  %v5586_v47 = vld [vmem:[%s6429_s29 + $0x40] sm:$0xff]  }
 0x641   : > { %5268 = vmatprep.mubr.msk.f32.mxu0 %vm2558_vm7, %v5805_v50 }
 0x642   : > { %v2557_v51 = vadd.s32 %v2556_v48, %v2554_v49  ;;  %v5587_v48 = vld [vmem:[%s6429_s29] sm:$0xff]  }
 0x643   : > { %v5588_v49 = vld [vmem:[%s6429_s29 + $0x80] sm:$0xff]   ;;  %s6868_s29 = sld [smem:[#allocation26_spill]] }
 0x644   : > { %vm2559_vm8 = vcmp.eq.s32.totalorder %v6351_v52, %v2557_v51 }
 0x645   : > { %5269 = vmatmul.mubr.msk.f32.vlgmr.msra.gmra.mxu0 %vm2559_vm8, %v5805_v50 }
 0x646   : > { %5272 = vmatpush3.bf16.msra.mxu0 %v5543_v53  ;;  %5287 = vmatprep.mubr.msk.bf16.mxu0 %vm5804_vm0, %v5803_v45 }
 0x647   : > { %5273 = vmatprep.subr.bf16.mxu0 %v5803_v45 }
 0x649   : > { %s1256_s26 = scalar_lea.vmem %s6868_s29, %s6883_s28 }
 0x64a   : > { %5274 = vmatpush3.bf16.msra.mxu0 %v5546_v54 }
 0x64b   : > { %5275 = vmatprep.subr.bf16.mxu0 %v5803_v45 }
 0x64e   : > { %5276 = vmatpush3.bf16.msra.mxu0 %v5549_v55 }
 0x64f   : > { %5277 = vmatprep.subr.bf16.mxu0 %v5803_v45 }
 0x652   : > { %5278 = vmatpush3.bf16.msra.mxu0 %v5552_v56  ;;  %v4733_v56 = vld [vmem:[%s1245_s11] ss:$0 sm:$0xff]  ;;  %s6869_s11 = sld [smem:[#allocation27_spill]] }
 0x653   : > { %5279 = vmatprep.subr.bf16.mxu0 %v5803_v45 }
 0x656   : > { %5280 = vmatpush3.bf16.msra.mxu0 %v5555_v57 }
 0x657   : > { %5281 = vmatprep.subr.bf16.mxu0 %v5803_v45 }
 0x658   : > { %s1264_s19 = scalar_lea.vmem %s6869_s11, %s6883_s28 }
 0x65a   : > { %5282 = vmatpush3.bf16.msra.mxu0 %v5558_v58 }
 0x65b   : > { %5283 = vmatprep.subr.bf16.mxu0 %v5803_v45 }
 0x65e   : > { %5284 = vmatpush3.bf16.msra.mxu0 %v5561_v23 }
 0x65f   : > { %5285 = vmatprep.subr.bf16.mxu0 %v5803_v45 }
 0x662   : > { %5286 = vmatpush3.bf16.msra.mxu0 %v5564_v30 }
 0x663   : > { %5291 = vmatprep.subr.bf16.mxu0 %v5803_v45 }
 0x705   : > { %v6432_v63 = vpop.f32.mrf.mxu0 }
 0x706   : > { %v2671_v0 = vrot.slane %v6432_v63, 7  ;;  %v2677_v2 = vrot.slane %v6432_v63, 1 }
 0x707   : > { %v6435_v1 = vpop.f32.mrf.mxu0 }
 0x708   : > { %v2670_v3 = vrot.slane %v6435_v1, 7  ;;  %v2676_v4 = vrot.slane %v6435_v1, 1  ;;  %v2684_v5 = vpack.c.bf16 %v6432_v63, %v6435_v1 }
 0x70a   : > { %v2672_v6 = vsel %vm1660_vm1, %v2670_v3, %v2671_v0  ;;  %v2673_v7 = vsel %vm1660_vm1, %v2671_v0, %v2670_v3  ;;  %v2678_v8 = vsel %vm1677_vm2, %v2676_v4, %v2677_v2  ;;  %v2679_v9 = vsel %vm1677_vm2, %v2677_v2, %v2676_v4  ;;  %2910 = vmatprep.mubr.bf16.mxu1 %v2684_v5 }
 0x70b   : > { %v2674_v10 = vmul.f32 %v2673_v7, %v6214_v31  ;;  %v2675_v11 = vmul.f32 %v2672_v6, %v6221_v39  ;;  %v2680_v12 = vmul.f32 %v2678_v8, %v6206_v27  ;;  %v2681_v13 = vmul.f32 %v2679_v9, %v6219_v38 }
 0x70d   : > { %v2683_v16 = vpack.c.bf16 %v2675_v11, %v2674_v10  ;;  %v2685_v17 = vpack.c.bf16 %v2681_v13, %v2680_v12 }
 0x70f   : > { %2911 = vmatmul.mubr.bf16.vlgmr.msra.gmra.mxu1 %v2683_v16  ;;  %5288 = vmatmul.mubr.bf16.vlgmr.msra.gmra.mxu0 %v2685_v17  ;;  %v5589_v16 = vld [vmem:[%s6073_s22 + $0x38] sm:$0xff]  }
 0x710   : > { %5011 = vmatpush3.bf16.msra.mxu1 %v5566_v14  ;;  %5292 = vmatpush3.bf16.msra.mxu0 %v5567_v15 }
 0x711   : > { %5012 = vmatprep.subr.bf16.mxu1 %v5568_v18  ;;  %5293 = vmatprep.subr.bf16.mxu0 %v5803_v45 }
 0x712   : > { %5307 = vmatprep.mubr.msk.bf16.mxu0 %vm5804_vm0, %v5803_v45 }
 0x714   : > { %5013 = vmatpush3.bf16.msra.mxu1 %v5569_v19  ;;  %5294 = vmatpush3.bf16.msra.mxu0 %v5570_v20  ;;  %v5590_v19 = vld [vmem:[%s6073_s22 + $0x30] sm:$0xff]   ;;  %v5591_v20 = vld [vmem:[%s6073_s22 + $0x28] sm:$0xff]  }
 0x715   : > { %5014 = vmatprep.subr.bf16.mxu1 %v5571_v21  ;;  %5295 = vmatprep.subr.bf16.mxu0 %v5803_v45  ;;  %v5592_v21 = vld [vmem:[%s6073_s22 + $0x20] sm:$0xff]  }
 0x718   : > { %5015 = vmatpush3.bf16.msra.mxu1 %v5572_v22  ;;  %5296 = vmatpush3.bf16.msra.mxu0 %v5573_v26  ;;  %v5593_v22 = vld [vmem:[%s6073_s22 + $0x18] sm:$0xff]   ;;  %v5594_v26 = vld [vmem:[%s6073_s22 + $0x10] sm:$0xff]  }
 0x719   : > { %5297 = vmatprep.subr.bf16.mxu0 %v5803_v45  ;;  %5016 = vmatprep.subr.bf16.mxu1 %v5574_v28  ;;  %v5595_v28 = vld [vmem:[%s6073_s22 + $0x8] sm:$0xff]  }
 0x71c   : > { %5017 = vmatpush3.bf16.msra.mxu1 %v5575_v32  ;;  %5298 = vmatpush3.bf16.msra.mxu0 %v5576_v34  ;;  %v5596_v32 = vld [vmem:[%s6073_s22] sm:$0xff]   ;;  %v5597_v34 = vld [vmem:[%s6367_s6 + $0x78] sm:$0xff]   ;;  %s6870_s22 = sld [smem:[#allocation29_spill]] }
 0x71d   : > { %5299 = vmatprep.subr.bf16.mxu0 %v5803_v45  ;;  %5018 = vmatprep.subr.bf16.mxu1 %v5577_v35  ;;  %v5598_v35 = vld [vmem:[%s6367_s6 + $0x38] sm:$0xff]  }
 0x720   : > { %5019 = vmatpush3.bf16.msra.mxu1 %v5578_v36  ;;  %5300 = vmatpush3.bf16.msra.mxu0 %v5579_v37  ;;  %v5601_v36 = vld [vmem:[%s6367_s6 + $0x70] sm:$0xff]   ;;  %v5599_v37 = vld [vmem:[%s6530_s27 + $0x78] sm:$0xff]  }
 0x721   : > { %5301 = vmatprep.subr.bf16.mxu0 %v5803_v45  ;;  %5020 = vmatprep.subr.bf16.mxu1 %v5580_v40  ;;  %v5602_v40 = vld [vmem:[%s6367_s6 + $0x30] sm:$0xff]  }
 0x722   : > { %s1272_s2 = scalar_lea.vmem %s6870_s22, %s6883_s28 }
 0x724   : > { %5021 = vmatpush3.bf16.msra.mxu1 %v5581_v41  ;;  %5302 = vmatpush3.bf16.msra.mxu0 %v5582_v42  ;;  %v5605_v41 = vld [vmem:[%s6367_s6 + $0x68] sm:$0xff]  }
 0x725   : > { %5303 = vmatprep.subr.bf16.mxu0 %v5803_v45  ;;  %5022 = vmatprep.subr.bf16.mxu1 %v5583_v43  ;;  %v5606_v42 = vld [vmem:[%s6367_s6 + $0x28] sm:$0xff]   ;;  %v5609_v43 = vld [vmem:[%s6367_s6 + $0x60] sm:$0xff]  }
 0x728   : > { %5023 = vmatpush3.bf16.msra.mxu1 %v5584_v44  ;;  %5304 = vmatpush3.bf16.msra.mxu0 %v5585_v46  ;;  %v5610_v44 = vld [vmem:[%s6367_s6 + $0x20] sm:$0xff]  }
 0x729   : > { %5305 = vmatprep.subr.bf16.mxu0 %v5803_v45  ;;  %5024 = vmatprep.subr.bf16.mxu1 %v5586_v47 }
 0x72c   : > { %5025 = vmatpush3.bf16.msra.mxu1 %v5587_v48  ;;  %5306 = vmatpush3.bf16.msra.mxu0 %v5588_v49 }
 0x72d   : > { %5311 = vmatprep.subr.bf16.mxu1 %v5803_v45  ;;  %5050 = vmatprep.subr.bf16.mxu0 %v5597_v34  ;;  %v4767_v34 = vld [vmem:[%s1256_s26] ss:$0 sm:$0xff] }
 0x7cf   : > { %v4995_v50 = vpop.f32.mrf.mxu1  ;;  %v2953_v51 = vpop.f32.mrf.mxu0 }
 0x7d1   : > { %v4996_v53 = vpop.f32.mrf.mxu1  ;;  %v5289_v54 = vpop.f32.mrf.mxu0 }
 0x7d2   : > { %v4997_v55 = vadd.f32 %v4996_v53, %v4995_v50 }
 0x7d3   : > { %v4998_v57 = vpop.f32.mrf.mxu1  ;;  %v2956_v58 = vpop.f32.mrf.mxu0 }
 0x7d4   : > { %v2954_v59 = vadd.f32 %v4997_v55, %v2953_v51  ;;  %v4758_v55 = vld [vmem:[%s1253_s30] ss:$0 sm:$0xff]  ;;  %s4836_s30 = sshll.u32 %s6883_s28, 5 }
 0x7d5   : > { %v4999_v60 = vpop.f32.mrf.mxu1  ;;  %v5290_v23 = vpop.f32.mrf.mxu0 }
 0x7d6   : > { %v6491_v61 = vadd.f32 %v4733_v56, %v2954_v59  ;;  %v5000_v24 = vadd.f32 %v4999_v60, %v4998_v57 }
 0x7d8   : > { %v2957_v30 = vadd.f32 %v5000_v24, %v2956_v58  ;;  %v2968_v62 = vmax.f32 %v6491_v61, 0.0 }
 0x7da   : > { %v6494_v0 = vadd.f32 %v4733_v56, %v2957_v30  ;;  %v2970_v3 = vrot.slane %v2968_v62, 7  ;;  %v2976_v4 = vrot.slane %v2968_v62, 1 }
 0x7dc   : > { %v2969_v2 = vmax.f32 %v6494_v0, 0.0 }
 0x7de   : > { %v2971_v5 = vrot.slane %v2969_v2, 7  ;;  %v2977_v6 = vrot.slane %v2969_v2, 1  ;;  %v2984_v7 = vpack.c.bf16 %v2969_v2, %v2968_v62  ;;  %v5600_v62 = vld [vmem:[%s6530_s27 + $0x38] sm:$0xff]  }
 0x7e0   : > { %3210 = vmatprep.mubr.bf16.mxu1 %v2984_v7  ;;  %v2972_v8 = vsel %vm1660_vm1, %v2970_v3, %v2971_v5  ;;  %v2973_v9 = vsel %vm1660_vm1, %v2971_v5, %v2970_v3  ;;  %v2978_v10 = vsel %vm1677_vm2, %v2976_v4, %v2977_v6  ;;  %v2979_v11 = vsel %vm1677_vm2, %v2977_v6, %v2976_v4  ;;  %v5603_v3 = vld [vmem:[%s6530_s27 + $0x70] sm:$0xff]   ;;  %v5607_v5 = vld [vmem:[%s6530_s27 + $0x68] sm:$0xff]   ;;  %v5611_v7 = vld [vmem:[%s6530_s27 + $0x60] sm:$0xff]  }
 0x7e1   : > { %v2974_v12 = vmul.f32 %v2973_v9, %v6214_v31  ;;  %v2975_v13 = vmul.f32 %v2972_v8, %v6221_v39  ;;  %v2980_v14 = vmul.f32 %v2978_v10, %v6206_v27  ;;  %v2981_v15 = vmul.f32 %v2979_v11, %v6219_v38  ;;  %v5604_v4 = vld [vmem:[%s6530_s27 + $0x30] sm:$0xff]   ;;  %v5608_v6 = vld [vmem:[%s6530_s27 + $0x28] sm:$0xff]   ;;  %v5612_v8 = vld [vmem:[%s6530_s27 + $0x20] sm:$0xff]  }
 0x7e2   : > { %v5613_v9 = vld [vmem:[%s6367_s6 + $0x58] sm:$0xff]  }
 0x7e3   : > { %v2983_v17 = vpack.c.bf16 %v2975_v13, %v2974_v12  ;;  %v2985_v18 = vpack.c.bf16 %v2981_v15, %v2980_v14  ;;  %v5614_v10 = vld [vmem:[%s6367_s6 + $0x18] sm:$0xff]   ;;  %v5617_v13 = vld [vmem:[%s6367_s6 + $0x50] sm:$0xff]  }
 0x7e4   : > { %v5615_v11 = vld [vmem:[%s6530_s27 + $0x58] sm:$0xff]   ;;  %v5618_v14 = vld [vmem:[%s6367_s6 + $0x10] sm:$0xff]  }
 0x7e5   : > { %3211 = vmatmul.mubr.bf16.vlgmr.msra.gmra.mxu1 %v2983_v17  ;;  %5308 = vmatmul.mubr.bf16.vlgmr.msra.gmra.mxu0 %v2985_v18  ;;  %v5616_v12 = vld [vmem:[%s6530_s27 + $0x18] sm:$0xff]   ;;  %v5619_v15 = vld [vmem:[%s6530_s27 + $0x50] sm:$0xff]   ;;  %v5621_v17 = vld [vmem:[%s6367_s6 + $0x48] sm:$0xff]  }
 0x7e6   : > { %5312 = vmatpush3.bf16.msra.mxu1 %v5589_v16  ;;  %5327 = vmatprep.mubr.msk.bf16.mxu1 %vm5804_vm0, %v5803_v45  ;;  %v5620_v16 = vld [vmem:[%s6530_s27 + $0x10] sm:$0xff]   ;;  %v5622_v18 = vld [vmem:[%s6367_s6 + $0x8] sm:$0xff]  }
 0x7e7   : > { %5313 = vmatprep.subr.bf16.mxu1 %v5803_v45  ;;  %5051 = vmatpush3.bf16.msra.mxu0 %v5598_v35 }
 0x7e8   : > { %5052 = vmatprep.subr.bf16.mxu0 %v5601_v36 }
 0x7ea   : > { %5314 = vmatpush3.bf16.msra.mxu1 %v5590_v19  ;;  %v5623_v19 = vld [vmem:[%s6530_s27 + $0x48] sm:$0xff]  }
 0x7eb   : > { %5315 = vmatprep.subr.bf16.mxu1 %v5803_v45  ;;  %5053 = vmatpush3.bf16.msra.mxu0 %v5602_v40 }
 0x7ec   : > { %5054 = vmatprep.subr.bf16.mxu0 %v5605_v41 }
 0x7ee   : > { %5316 = vmatpush3.bf16.msra.mxu1 %v5591_v20  ;;  %v5624_v20 = vld [vmem:[%s6530_s27 + $0x8] sm:$0xff]  }
 0x7ef   : > { %5317 = vmatprep.subr.bf16.mxu1 %v5803_v45  ;;  %5055 = vmatpush3.bf16.msra.mxu0 %v5606_v42 }
 0x7f0   : > { %5056 = vmatprep.subr.bf16.mxu0 %v5609_v43 }
 0x7f2   : > { %5318 = vmatpush3.bf16.msra.mxu1 %v5592_v21  ;;  %v5625_v21 = vld [vmem:[%s6367_s6 + $0x40] sm:$0xff]  }
 0x7f3   : > { %5319 = vmatprep.subr.bf16.mxu1 %v5803_v45  ;;  %5057 = vmatpush3.bf16.msra.mxu0 %v5610_v44 }
 0x7f4   : > { %5058 = vmatprep.subr.bf16.mxu0 %v5613_v9  ;;  %v6650_v9 = vld [vmem:[%s6570_s25 + $0x58] sm:$0xff]  }
 0x7f6   : > { %5320 = vmatpush3.bf16.msra.mxu1 %v5593_v22  ;;  %v5626_v22 = vld [vmem:[%s6367_s6] sm:$0xff]   ;;  %s6872_s6 = sld [smem:[#allocation31_spill]] }
 0x7f7   : > { %5321 = vmatprep.subr.bf16.mxu1 %v5803_v45  ;;  %5059 = vmatpush3.bf16.msra.mxu0 %v5614_v10  ;;  %v6653_v10 = vld [vmem:[%s6570_s25 + $0x90] sm:$0xff]  }
 0x7f8   : > { %5060 = vmatprep.subr.bf16.mxu0 %v5617_v13  ;;  %v6666_v13 = vld [vmem:[%s6570_s25 + $0x88] sm:$0xff]  }
 0x7fa   : > { %5322 = vmatpush3.bf16.msra.mxu1 %v5594_v26  ;;  %v5627_v26 = vld [vmem:[%s6530_s27 + $0x40] sm:$0xff]  }
 0x7fb   : > { %5323 = vmatprep.subr.bf16.mxu1 %v5803_v45  ;;  %5061 = vmatpush3.bf16.msra.mxu0 %v5618_v14  ;;  %v6669_v14 = vld [vmem:[%s6570_s25 + $0x10] sm:$0xff]  }
 0x7fc   : > { %5062 = vmatprep.subr.bf16.mxu0 %v5621_v17  ;;  %v6682_v17 = vld [vmem:[%s6570_s25 + $0x8] sm:$0xff]   ;;  %s1289_s29 = scalar_lea.vmem %s6872_s6, %s6883_s28 }
 0x7fe   : > { %5324 = vmatpush3.bf16.msra.mxu1 %v5595_v28  ;;  %v5628_v28 = vld [vmem:[%s6530_s27] sm:$0xff]  }
 0x7ff   : > { %5325 = vmatprep.subr.bf16.mxu1 %v5803_v45  ;;  %5063 = vmatpush3.bf16.msra.mxu0 %v5622_v18  ;;  %v6689_v18 = vld [vmem:[%s6570_s25 + $0x40] sm:$0xff]  }
 0x800   : > { %5064 = vmatprep.subr.bf16.mxu0 %v5625_v21 }
 0x802   : > { %5326 = vmatpush3.bf16.msra.mxu1 %v5596_v32  ;;  %v6573_v32 = vld [vmem:[%s6570_s25 + $0x78] sm:$0xff]  }
 0x803   : > { %5072 = vmatprep.subr.bf16.mxu1 %v5599_v37  ;;  %5065 = vmatpush3.bf16.msra.mxu0 %v5626_v22 }
 0x804   : > { %5094 = vmatprep.subr.bf16.mxu0 %v6573_v32 }
 0x8a5   : > { %v5026_v46 = vpop.f32.mrf.mxu1  ;;  %v3253_v47 = vpop.f32.mrf.mxu0 }
 0x8a7   : > { %v5027_v48 = vpop.f32.mrf.mxu1  ;;  %v5309_v49 = vpop.f32.mrf.mxu0 }
 0x8a8   : > { %v5028_v50 = vadd.f32 %v5027_v48, %v5026_v46 }
 0x8a9   : > { %v5029_v51 = vpop.f32.mrf.mxu1  ;;  %v3256_v53 = vpop.f32.mrf.mxu0 }
 0x8aa   : > { %v3254_v54 = vadd.f32 %v5028_v50, %v3253_v47 }
 0x8ab   : > { %v5030_v56 = vpop.f32.mrf.mxu1  ;;  %v5310_v57 = vpop.f32.mrf.mxu0 }
 0x8ac   : > { %v5031_v58 = vadd.f32 %v5030_v56, %v5029_v51  ;;  %v3266_v59 = vadd.f32 %v4758_v55, %v3254_v54 }
 0x8ae   : > { %v3257_v60 = vadd.f32 %v5031_v58, %v3256_v53  ;;  %v3268_v24 = vmax.f32 %v3266_v59, 0.0  ;;  %v6595_v58 = vld [vmem:[%s6570_s25 + $0x38] sm:$0xff]  }
 0x8b0   : > { %v3267_v23 = vadd.f32 %v4758_v55, %v3257_v60 }
 0x8b2   : > { %v3269_v30 = vmax.f32 %v3267_v23, 0.0  ;;  %v6598_v23 = vld [vmem:[%s6570_s25 + $0xb8] sm:$0xff]  }
 0x8b4   : > { %v3271_v2 = vpack.c.bf16 %v3269_v30, %v3268_v24  ;;  %v6601_v24 = vld [vmem:[%s6570_s25 + $0x70] sm:$0xff]  }
 0x8b5   : > { %v6605_v30 = vld [vmem:[%s6570_s25 + $0x30] sm:$0xff]  }
 0x8b6   : > { %5328 = vmatmul.mubr.bf16.vlgmr.msra.gmra.mxu1 %v3271_v2  ;;  %v6613_v2 = vld [vmem:[%s6570_s25 + $0x68] sm:$0xff]  }
 0x8b7   : > { %5073 = vmatpush3.bf16.msra.mxu1 %v5600_v62  ;;  %v6609_v62 = vld [vmem:[%s6570_s25 + $0xb0] sm:$0xff]  }
 0x8b8   : > { %5074 = vmatprep.subr.bf16.mxu1 %v5603_v3  ;;  %v6620_v3 = vld [vmem:[%s6570_s25 + $0x28] sm:$0xff]  }
 0x8bb   : > { %5075 = vmatpush3.bf16.msra.mxu1 %v5604_v4  ;;  %v6624_v4 = vld [vmem:[%s6570_s25 + $0xa8] sm:$0xff]  }
 0x8bc   : > { %5076 = vmatprep.subr.bf16.mxu1 %v5607_v5  ;;  %v6628_v5 = vld [vmem:[%s6570_s25 + $0x60] sm:$0xff]  }
 0x8bf   : > { %5077 = vmatpush3.bf16.msra.mxu1 %v5608_v6  ;;  %v6633_v6 = vld [vmem:[%s6570_s25 + $0x20] sm:$0xff]  }
 0x8c0   : > { %5078 = vmatprep.subr.bf16.mxu1 %v5611_v7  ;;  %v6637_v7 = vld [vmem:[%s6570_s25 + $0xa0] sm:$0xff]  }
 0x8c3   : > { %5079 = vmatpush3.bf16.msra.mxu1 %v5612_v8  ;;  %v6644_v8 = vld [vmem:[%s6570_s25 + $0x98] sm:$0xff]  }
 0x8c4   : > { %5080 = vmatprep.subr.bf16.mxu1 %v5615_v11  ;;  %v6656_v11 = vld [vmem:[%s6570_s25 + $0x18] sm:$0xff]  }
 0x8c7   : > { %5081 = vmatpush3.bf16.msra.mxu1 %v5616_v12  ;;  %v6663_v12 = vld [vmem:[%s6570_s25 + $0x50] sm:$0xff]  }
 0x8c8   : > { %5082 = vmatprep.subr.bf16.mxu1 %v5619_v15  ;;  %v6676_v15 = vld [vmem:[%s6570_s25 + $0x48] sm:$0xff]  }
 0x8cb   : > { %5083 = vmatpush3.bf16.msra.mxu1 %v5620_v16  ;;  %v6679_v16 = vld [vmem:[%s6570_s25 + $0x80] sm:$0xff]  }
 0x8cc   : > { %5084 = vmatprep.subr.bf16.mxu1 %v5623_v19  ;;  %v6693_v19 = vld [vmem:[%s6570_s25] sm:$0xff]   ;;  %s6753_s25 = scalar_lea.vmem %s6871_s24, %s4836_s30 }
 0x8cf   : > { %5085 = vmatpush3.bf16.msra.mxu1 %v5624_v20 }
 0x8d0   : > { %5086 = vmatprep.subr.bf16.mxu1 %v5627_v26 }
 0x8d3   : > { %5087 = vmatpush3.bf16.msra.mxu1 %v5628_v28 }
 0x8d4   : > { %5331 = vmatprep.subr.bf16.mxu1 %v5803_v45 }
 0x976   : > { %v3370_v35 = vpop.f32.mrf.mxu1 }
 0x977   : > { %v3383_v36 = vadd.f32 %v4767_v34, %v3370_v35  ;;  %v4784_v35 = vld [vmem:[%s1264_s19] ss:$0 sm:$0xff] }
 0x978   : > { %v5329_v37 = vpop.f32.mrf.mxu1 }
 0x979   : > { %v3385_v40 = vadd.f32 %v3383_v36, %v6491_v61 }
 0x97a   : > { %v3373_v41 = vpop.f32.mrf.mxu1 }
 0x97b   : > { %v3384_v42 = vadd.f32 %v4767_v34, %v3373_v41  ;;  %v3387_v46 = vrot.slane %v3385_v40, 7  ;;  %v3393_v47 = vrot.slane %v3385_v40, 1 }
 0x97c   : > { %v5330_v43 = vpop.f32.mrf.mxu1 }
 0x97d   : > { %v3386_v44 = vadd.f32 %v3384_v42, %v6494_v0 }
 0x97f   : > { %v3388_v48 = vrot.slane %v3386_v44, 7  ;;  %v3394_v49 = vrot.slane %v3386_v44, 1  ;;  %v3401_v50 = vpack.c.bf16 %v3386_v44, %v3385_v40 }
 0x981   : > { %3562 = vmatprep.mubr.bf16.mxu0 %v3401_v50  ;;  %v3389_v51 = vsel %vm1660_vm1, %v3387_v46, %v3388_v48  ;;  %v3390_v61 = vsel %vm1660_vm1, %v3388_v48, %v3387_v46  ;;  %v3395_v53 = vsel %vm1677_vm2, %v3393_v47, %v3394_v49  ;;  %v3396_v0 = vsel %vm1677_vm2, %v3394_v49, %v3393_v47 }
 0x982   : > { %v3391_v54 = vmul.f32 %v3390_v61, %v6214_v31  ;;  %v3392_v55 = vmul.f32 %v3389_v51, %v6221_v39  ;;  %v3397_v56 = vmul.f32 %v3395_v53, %v6206_v27  ;;  %v3398_v57 = vmul.f32 %v3396_v0, %v6219_v38 }
 0x984   : > { %v3400_v59 = vpack.c.bf16 %v3392_v55, %v3391_v54  ;;  %v3579_v60 = vpack.c.bf16 %v3398_v57, %v3397_v56 }
 0x986   : > { %3563 = vmatmul.mubr.bf16.vlgmr.msra.gmra.mxu0 %v3400_v59  ;;  %3740 = vmatprep.mubr.bf16.mxu1 %v3579_v60 }
 0x987   : > { %3741 = vmatmul.mubr.bf16.vlgmr.msra.gmra.mxu1 %v3401_v50  ;;  %5095 = vmatpush3.bf16.msra.mxu0 %v6595_v58 }
 0x988   : > { %5332 = vmatpush3.bf16.msra.mxu1 %v6598_v23  ;;  %5096 = vmatprep.subr.bf16.mxu0 %v6601_v24 }
 0x989   : > { %5333 = vmatprep.subr.bf16.mxu1 %v5803_v45  ;;  %5347 = vmatprep.mubr.msk.bf16.mxu1 %vm5804_vm0, %v5803_v45 }
 0x98b   : > { %5097 = vmatpush3.bf16.msra.mxu0 %v6605_v30 }
 0x98c   : > { %5334 = vmatpush3.bf16.msra.mxu1 %v6609_v62  ;;  %5098 = vmatprep.subr.bf16.mxu0 %v6613_v2 }
 0x98d   : > { %5335 = vmatprep.subr.bf16.mxu1 %v5803_v45 }
 0x98f   : > { %5099 = vmatpush3.bf16.msra.mxu0 %v6620_v3 }
 0x990   : > { %5336 = vmatpush3.bf16.msra.mxu1 %v6624_v4  ;;  %5100 = vmatprep.subr.bf16.mxu0 %v6628_v5 }
 0x991   : > { %5337 = vmatprep.subr.bf16.mxu1 %v5803_v45 }
 0x993   : > { %5101 = vmatpush3.bf16.msra.mxu0 %v6633_v6 }
 0x994   : > { %5338 = vmatpush3.bf16.msra.mxu1 %v6637_v7  ;;  %5102 = vmatprep.subr.bf16.mxu0 %v6650_v9 }
 0x995   : > { %5339 = vmatprep.subr.bf16.mxu1 %v5803_v45 }
 0x997   : > { %5103 = vmatpush3.bf16.msra.mxu0 %v6656_v11 }
 0x998   : > { %5340 = vmatpush3.bf16.msra.mxu1 %v6644_v8  ;;  %5104 = vmatprep.subr.bf16.mxu0 %v6663_v12 }
 0x999   : > { %5341 = vmatprep.subr.bf16.mxu1 %v5803_v45 }
 0x99b   : > { %5105 = vmatpush3.bf16.msra.mxu0 %v6669_v14 }
 0x99c   : > { %5342 = vmatpush3.bf16.msra.mxu1 %v6653_v10  ;;  %5106 = vmatprep.subr.bf16.mxu0 %v6676_v15 }
 0x99d   : > { %5343 = vmatprep.subr.bf16.mxu1 %v5803_v45 }
 0x99f   : > { %5107 = vmatpush3.bf16.msra.mxu0 %v6682_v17 }
 0x9a0   : > { %5344 = vmatpush3.bf16.msra.mxu1 %v6666_v13  ;;  %5108 = vmatprep.subr.bf16.mxu0 %v6689_v18 }
 0x9a1   : > { %5345 = vmatprep.subr.bf16.mxu1 %v5803_v45 }
 0x9a3   : > { %5109 = vmatpush3.bf16.msra.mxu0 %v6693_v19 }
 0x9a4   : > { %5346 = vmatpush3.bf16.msra.mxu1 %v6679_v16  ;;  %5125 = vmatprep.subr.bf16.mxu0 %v6573_v32 }
 0x9a5   : > { %5351 = vmatprep.subr.bf16.mxu1 %v5803_v45 }
 0xa46   : > { %v5066_v20 = vpop.f32.mrf.mxu0 }
 0xa47   : > { %v5088_v21 = vpop.f32.mrf.mxu1 }
 0xa48   : > { %v5067_v22 = vpop.f32.mrf.mxu0 }
 0xa49   : > { %v5089_v26 = vpop.f32.mrf.mxu1  ;;  %v5068_v36 = vadd.f32 %v5067_v22, %v5066_v20 }
 0xa4a   : > { %v5090_v28 = vadd.f32 %v5089_v26, %v5088_v21  ;;  %v5069_v34 = vpop.f32.mrf.mxu0 }
 0xa4b   : > { %v5091_v37 = vpop.f32.mrf.mxu1  ;;  %v3577_v46 = vadd.f32 %v5068_v36, %v4784_v35 }
 0xa4c   : > { %v5070_v40 = vpop.f32.mrf.mxu0  ;;  %v3749_v43 = vadd.f32 %v5090_v28, %v4784_v35 }
 0xa4d   : > { %v5071_v41 = vadd.f32 %v5070_v40, %v5069_v34  ;;  %v5092_v42 = vpop.f32.mrf.mxu1 }
 0xa4e   : > { %v5093_v44 = vadd.f32 %v5092_v42, %v5091_v37  ;;  %v3751_v49 = vrot.slane %v3749_v43, 7  ;;  %v5655_v37 = vld [vmem:[%s6125_s17 + $0x10] sm:$0xff] }
 0xa4f   : > { %v3578_v32 = vadd.f32 %v5071_v41, %v4784_v35 }
 0xa50   : > { %v3750_v47 = vadd.f32 %v5093_v44, %v4784_v35  ;;  %v5656_v44 = vld [vmem:[%s6125_s17 + $0x30] sm:$0xff] }
 0xa51   : > { %v3765_v48 = vpack.c.bf16 %v3578_v32, %v3577_v46 }
 0xa52   : > { %v3752_v50 = vrot.slane %v3750_v47, 7  ;;  %v3766_v51 = vpack.c.bf16 %v3750_v47, %v3749_v43  ;;  %v2655_v43 = vsub.f32 %v6435_v1, %v6336_v25 }
 0xa53   : > { %3991 = vmatprep.mubr.bf16.mxu0 %v3765_v48 }
 0xa54   : > { %v3753_v61 = vsel %vm1660_vm1, %v3751_v49, %v3752_v50  ;;  %v3754_v53 = vsel %vm1660_vm1, %v3752_v50, %v3751_v49  ;;  %5348 = vmatmul.mubr.bf16.vlgmr.msra.gmra.mxu1 %v3766_v51  ;;  %v2657_v47 = vmul.f32 %v2655_v43, %v2655_v43 }
 0xa55   : > { %5352 = vmatpush3.bf16.msra.mxu1 %v6598_v23  ;;  %v3755_v0 = vmul.f32 %v3754_v53, %v6214_v31  ;;  %v3756_v54 = vmul.f32 %v3753_v61, %v6221_v39  ;;  %5367 = vmatprep.mubr.msk.bf16.mxu1 %vm5804_vm0, %v5803_v45  ;;  %v3758_v31 = vrot.slane %v3578_v32, 1  ;;  %v3757_v39 = vrot.slane %v3577_v46, 1 }
 0xa56   : > { %5353 = vmatprep.subr.bf16.mxu1 %v5803_v45 }
 0xa57   : > { %v3764_v55 = vpack.c.bf16 %v3756_v54, %v3755_v0  ;;  %v3759_v56 = vsel %vm1677_vm2, %v3757_v39, %v3758_v31  ;;  %v3760_v57 = vsel %vm1677_vm2, %v3758_v31, %v3757_v39 }
 0xa58   : > { %v3762_v59 = vmul.f32 %v3760_v57, %v6219_v38 }
 0xa59   : > { %5354 = vmatpush3.bf16.msra.mxu1 %v6609_v62  ;;  %3992 = vmatmul.mubr.bf16.vlgmr.msra.gmra.mxu0 %v3764_v55 }
 0xa5a   : > { %5126 = vmatpush3.bf16.msra.mxu0 %v6595_v58  ;;  %4082 = vmatprep.mubr.bf16.mxu0 %v3766_v51  ;;  %v3761_v58 = vmul.f32 %v3759_v56, %v6206_v27 }
 0xa5b   : > { %5355 = vmatprep.subr.bf16.mxu1 %v5803_v45  ;;  %5127 = vmatprep.subr.bf16.mxu0 %v6601_v24 }
 0xa5c   : > { %v4049_v29 = vpack.c.bf16 %v3762_v59, %v3761_v58 }
 0xa5d   : > { %5356 = vmatpush3.bf16.msra.mxu1 %v6624_v4 }
 0xa5e   : > { %5128 = vmatpush3.bf16.msra.mxu0 %v6605_v30  ;;  %5357 = vmatprep.subr.bf16.mxu1 %v5803_v45 }
 0xa5f   : > { %5129 = vmatprep.subr.bf16.mxu0 %v6613_v2  ;;  %v4825_v2 = vld [vmem:[%s1272_s2] ss:$0 sm:$0xff] }
 0xa61   : > { %5358 = vmatpush3.bf16.msra.mxu1 %v6637_v7 }
 0xa62   : > { %5130 = vmatpush3.bf16.msra.mxu0 %v6620_v3  ;;  %5359 = vmatprep.subr.bf16.mxu1 %v5803_v45 }
 0xa63   : > { %5131 = vmatprep.subr.bf16.mxu0 %v6628_v5 }
 0xa65   : > { %5360 = vmatpush3.bf16.msra.mxu1 %v6644_v8  ;;  %v5653_v8 = vld [vmem:[%s6125_s17 + $0x8] sm:$0xff] }
 0xa66   : > { %5132 = vmatpush3.bf16.msra.mxu0 %v6633_v6  ;;  %5361 = vmatprep.subr.bf16.mxu1 %v5803_v45 }
 0xa67   : > { %5133 = vmatprep.subr.bf16.mxu0 %v6650_v9 }
 0xa69   : > { %5362 = vmatpush3.bf16.msra.mxu1 %v6653_v10 }
 0xa6a   : > { %5134 = vmatpush3.bf16.msra.mxu0 %v6656_v11  ;;  %5363 = vmatprep.subr.bf16.mxu1 %v5803_v45 }
 0xa6b   : > { %5135 = vmatprep.subr.bf16.mxu0 %v6663_v12  ;;  %v5654_v12 = vld [vmem:[%s6125_s17 + $0x28] sm:$0xff] }
 0xa6d   : > { %5364 = vmatpush3.bf16.msra.mxu1 %v6666_v13 }
 0xa6e   : > { %5136 = vmatpush3.bf16.msra.mxu0 %v6669_v14  ;;  %5365 = vmatprep.subr.bf16.mxu1 %v5803_v45 }
 0xa6f   : > { %5137 = vmatprep.subr.bf16.mxu0 %v6676_v15 }
 0xa71   : > { %5366 = vmatpush3.bf16.msra.mxu1 %v6679_v16 }
 0xa72   : > { %5138 = vmatpush3.bf16.msra.mxu0 %v6682_v17 }
 0xa73   : > { %5139 = vmatprep.subr.bf16.mxu0 %v6689_v18 }
 0xa74   : > { %5368 = vmatmul.mubr.bf16.vlgmr.msra.gmra.mxu1 %v4049_v29 }
 0xa76   : > { %5140 = vmatpush3.bf16.msra.mxu0 %v6693_v19 }
 0xa79   : > { %4083 = vmatmul.mubr.bf16.vlgmr.msra.gmra.mxu0 %v3765_v48  ;;  %v2656_v48 = vsub.f32 %v6432_v63, %v6340_v33 }
 0xa7b   : > { %v2658_v49 = vmul.f32 %v2656_v48, %v2656_v48 }
 0xb14   : > { %v4034_v45 = vpop.f32.mrf.mxu1 }
 0xb16   : > { %v5349_v60 = vpop.f32.mrf.mxu1 }
 0xb18   : > { %v4037_v27 = vpop.f32.mrf.mxu1 }
 0xb19   : > { %v5110_v23 = vpop.f32.mrf.mxu0 }
 0xb1a   : > { %v5350_v38 = vpop.f32.mrf.mxu1 }
 0xb1b   : > { %v5111_v24 = vpop.f32.mrf.mxu0 }
 0xb1c   : > { %v5112_v30 = vadd.f32 %v5111_v24, %v5110_v23 }
 0xb1d   : > { %v5113_v62 = vpop.f32.mrf.mxu0 }
 0xb1e   : > { %v4035_v3 = vadd.f32 %v5112_v30, %v4034_v45 }
 0xb1f   : > { %v5114_v4 = vpop.f32.mrf.mxu0 }
 0xb20   : > { %v5115_v5 = vadd.f32 %v5114_v4, %v5113_v62  ;;  %v4047_v6 = vadd.f32 %v4825_v2, %v4035_v3 }
 0xb22   : > { %v4038_v7 = vadd.f32 %v5115_v5, %v4037_v27  ;;  %v4138_v9 = vsub.f32 %v4047_v6, %v5653_v8  ;;  %4134 = vst [vmem:[%s6753_s25] sm:$0xff] %v4047_v6 }
 0xb24   : > { %v4142_v10 = vmul.f32 %v4138_v9, %v4138_v9  ;;  %v4048_v11 = vadd.f32 %v4825_v2, %v4038_v7 }
 0xb26   : > { %4144 = vadd.xlane.f32.xlu1 %v4142_v10  ;;  %v4139_v13 = vsub.f32 %v4048_v11, %v5654_v12  ;;  %4136 = vst [vmem:[%s6753_s25 + $0x10] sm:$0xff] %v4048_v11 }
 0xb28   : > { %v4143_v14 = vmul.f32 %v4139_v13, %v4139_v13 }
 0xb2a   : > { %4146 = vadd.xlane.f32.xlu0 %v4143_v14 }
 0xb34   : > { %v4125_v15 = vpop.f32.mrf.mxu1 }
 0xb36   : > { %v5369_v16 = vpop.f32.mrf.mxu1 }
 0xb38   : > { %v4128_v17 = vpop.f32.mrf.mxu1 }
 0xb39   : > { %v5141_v18 = vpop.f32.mrf.mxu0 }
 0xb3a   : > { %v5370_v19 = vpop.f32.mrf.mxu1 }
 0xb3b   : > { %v5142_v20 = vpop.f32.mrf.mxu0 }
 0xb3c   : > { %v5143_v21 = vadd.f32 %v5142_v20, %v5141_v18 }
 0xb3d   : > { %v5144_v22 = vpop.f32.mrf.mxu0 }
 0xb3e   : > { %v4126_v26 = vadd.f32 %v5143_v21, %v4125_v15 }
 0xb3f   : > { %v5145_v28 = vpop.f32.mrf.mxu0 }
 0xb40   : > { %v5146_v34 = vadd.f32 %v5145_v28, %v5144_v22  ;;  %v4132_v35 = vadd.f32 %v4825_v2, %v4126_v26 }
 0xb42   : > { %v4129_v36 = vadd.f32 %v5146_v34, %v4128_v17  ;;  %4135 = vst [vmem:[%s6753_s25 + $0x8] sm:$0xff] %v4132_v35  ;;  %v4140_v40 = vsub.f32 %v4132_v35, %v5655_v37 }
 0xb44   : > { %v4155_v41 = vmul.f32 %v4140_v40, %v4140_v40  ;;  %v4133_v42 = vadd.f32 %v4825_v2, %v4129_v36 }
 0xb46   : > { %4157 = vadd.xlane.f32.xlu1 %v4155_v41  ;;  %4137 = vst [vmem:[%s6753_s25 + $0x18] sm:$0xff] %v4133_v42  ;;  %v4141_v46 = vsub.f32 %v4133_v42, %v5656_v44 }
 0xb48   : > { %v4156_v32 = vmul.f32 %v4141_v46, %v4141_v46 }
 0xb4a   : > { %4159 = vadd.xlane.f32.xlu0 %v4156_v32  ;;  %2659 = vadd.xlane.f32.xlu1 %v2657_v47 }
 0xb4e   : > { %2661 = vadd.xlane.f32.xlu0 %v2658_v49 }
 0xbaf   : > { %v4145_v51 = vpop.xlane.xlu1 %4144 }
 0xbb3   : > { %v4147_v50 = vpop.xlane.xlu0 %4146 }
 0xbb4   : > { %v4148_v61 = vadd.f32 %v4147_v50, %v4145_v51 }
 0xbb6   : > { %v4149_v53 = vrot.slane %v4148_v61, 4 }
 0xbb8   : > { %v4150_v0 = vadd.f32 %v4149_v53, %v4148_v61 }
 0xbba   : > { %v4151_v1 = vrot.slane %v4150_v0, 2 }
 0xbbc   : > { %v4152_v57 = vadd.f32 %v4151_v1, %v4150_v0 }
 0xbbe   : > { %v4153_v29 = vrot.slane %v4152_v57, 1 }
 0xbc0   : > { %v4154_v38 = vadd.f32 %v4153_v29, %v4152_v57 }
 0xbcf   : > { %v4158_v54 = vpop.xlane.xlu1 %4157 }
 0xbd3   : > { %v4160_v25 = vpop.xlane.xlu0 %4159  ;;  %v2660_v39 = vpop.xlane.xlu1 %2659 }
 0xbd4   : > { %v4161_v55 = vadd.f32 %v4160_v25, %v4158_v54 }
 0xbd6   : > { %v4162_v31 = vrot.slane %v4161_v55, 4 }
 0xbd7   : > { %v2662_v56 = vpop.xlane.xlu0 %2661 }
 0xbd8   : > { %v4163_v58 = vadd.f32 %v4162_v31, %v4161_v55  ;;  %v2663_v59 = vadd.f32 %v2662_v56, %v2660_v39 }
 0xbda   : > { %v4164_v33 = vrot.slane %v4163_v58, 2  ;;  %v2664_v63 = vrot.slane %v2663_v59, 4 }
 0xbdc   : > { %v4165_v45 = vadd.f32 %v4164_v33, %v4163_v58  ;;  %v2665_v60 = vadd.f32 %v2664_v63, %v2663_v59 }
 0xbde   : > { %v4166_v27 = vrot.slane %v4165_v45, 1  ;;  %v2666_v23 = vrot.slane %v2665_v60, 2 }
 0xbe0   : > { %v4167_v24 = vadd.f32 %v4166_v27, %v4165_v45  ;;  %v2667_v30 = vadd.f32 %v2666_v23, %v2665_v60 }
 0xbe2   : > { %v4168_v62 = vadd.f32 %v4167_v24, %v4154_v38  ;;  %v2668_v2 = vrot.slane %v2667_v30, 1 }
 0xbe4   : > { %v2669_v3 = vadd.f32 %v2668_v2, %v2667_v30  ;;  %v4172_v5 = vsel %vm4171_vm10, %v4168_v62, 0.0 }
 0xbe6   : > { %v4170_v4 = vsel %vm4169_vm9, %v2669_v3, 0.0 }
 0xbe7   : > { %v4173_v6 = vadd.f32 %v4172_v5, %v4170_v4 }
 0xbe9   : > { %4174 = vst [vmem:[%s1289_s29] sm:$0x1] %v4173_v6 }
 0xbea PF: > { %s43_s4 = sadd.s32 1, %s5795_s4   ;;  %s6873_s26 = sld [smem:[#allocation9_spill]] }
 0xbeb   : > { %p40_p7 = scmp.ge.s32.totalorder %s43_s4, 4   ;;  %s6874_s7 = sld [smem:[#allocation11_spill]] }
 0xbec   : > { %s6875_s0 = sld [smem:[#allocation10_spill]]  ;;  %s6876_s27 = smov %s5779_s3 }
 0xbed   : > { %s6878_s28 = smov %s5791_s8 }
 0xbee   :  { %42 = sbr.rel (!%p40_p7) target bundleno = 27 (0x1b), region = 256 }
 0xbf0   : > { %s6877_s3 = smov %s6873_s26 }
 0xbf2   : > { %s6879_s8 = smov %s6875_s0 }
 0xbf3   :  { %4225 = vsyncpa [#allocation3], 1 }
 0xbf4   :  { %4227 = vsyncpa [#allocation3 + $0x1], 1 }
 0xbf5   :  { %4228 = vsyncpa [#allocation5], 1 }
 0xbf6   :  { %4230 = vsyncpa [#allocation5 + $0x1], 1 }

</bundles_post_ra>
